<compile_context>
chip_gen: v5e
topology: v5e:2x2
jax: 0.10.0
libtpu: 0.0.40
codegen_flags: <defaults>
</compile_context>

<pallas_src>
import functools
import math

import jax
import jax.numpy as jnp
from jax import lax
from jax.experimental import pallas as pl
from jax.experimental.pallas import tpu as pltpu


def _round_up(x, m):
    return ((x + m - 1) // m) * m


# ----------------------------- Pallas kernel ------------------------------- #

def _bilstm_mean_kernel(lens_ref, invl_ref, xf_ref, xb_ref,
                        wih_f_ref, whh_f_ref, b_f_ref,
                        wih_b_ref, whh_b_ref, b_b_ref,
                        out_ref,
                        gxf_ref, gxb_ref,
                        hf_ref, cf_ref, af_ref,
                        hb_ref, cb_ref, ab_ref):
    """One time-chunk of the fused bidirectional LSTM recurrence + masked mean.

    lens_ref : (Bp, 1)      i32   valid length per padded batch row (0 = pad row)
    invl_ref : (Bp, 1)      f32   1 / max(len, 1)
    xf/xb    : (Tc*Bp, D)   bf16  time-major chunk of fwd / per-seq-reversed input
    wih_*    : (D,  Gp)     bf16  input->gate weights, gates packed [i|f|g|o]=4H,
                                  padded only as a whole to Gp = round_up(4H, 128)
    whh_*    : (H,  Gp)     bf16  hidden->gate weights
    b_*      : (1,  Gp)     f32   bias_ih + bias_hh
    out_ref  : (Bp, 2H)     f32   [mean fwd h | mean bwd h]
    gx*_ref  : (Tc, Bp, Gp) bf16  scratch: hoisted x @ W_ih for this chunk
    h*/c*/a* : (Bp, H)      f32   recurrent state / masked-mean accumulators
                                  (persist across grid steps)
    """
    Bp, two_h = out_ref.shape
    H = two_h // 2
    Gp = wih_f_ref.shape[1]
    Tc = gxf_ref.shape[0]
    chunk = pl.program_id(0)

    @pl.when(chunk == 0)
    def _init():
        for r in (hf_ref, cf_ref, af_ref, hb_ref, cb_ref, ab_ref):
            r[...] = jnp.zeros_like(r)

    # --- hoisted input projection for this chunk -> bf16 VMEM scratch -------
    # One MXU matmul per GT time steps (bounds transient vregs); only the small
    # h @ W_hh matmul remains on the serial critical path below.
    GT = 4 if Tc % 4 == 0 else (2 if Tc % 2 == 0 else 1)
    for g in range(Tc // GT):
        r0 = g * GT * Bp
        gx_f = jnp.dot(xf_ref[r0:r0 + GT * Bp, :], wih_f_ref[...],
                       preferred_element_type=jnp.float32)
        gx_b = jnp.dot(xb_ref[r0:r0 + GT * Bp, :], wih_b_ref[...],
                       preferred_element_type=jnp.float32)
        for j in range(GT):
            gxf_ref[g * GT + j] = gx_f[j * Bp:(j + 1) * Bp, :].astype(jnp.bfloat16)
            gxb_ref[g * GT + j] = gx_b[j * Bp:(j + 1) * Bp, :].astype(jnp.bfloat16)

    b_f = b_f_ref[...]
    b_b = b_b_ref[...]
    lens = lens_ref[...]                         # (Bp, 1) i32
    inv_len = invl_ref[...]                      # (Bp, 1) f32

    # Lane mask selecting the tanh ("g") gate inside the packed [i|f|g|o]
    # layout; hoisted out of the recurrence loop.
    lane = lax.broadcasted_iota(jnp.int32, (Bp, Gp), 1)
    is_g = jnp.logical_and(lane >= 2 * H, lane < 3 * H)

    def cell(gates, c):
        # Single tanh (one EUP op) activates all four packed gates:
        #   sigmoid(x) = 0.5 * (1 + tanh(x / 2)) for i/f/o, tanh(x) for g.
        pre = jnp.where(is_g, gates, 0.5 * gates)
        th = jnp.tanh(pre)
        act = jnp.where(is_g, th, 0.5 + 0.5 * th)
        i_g = act[:, 0 * H:1 * H]
        f_g = act[:, 1 * H:2 * H]
        g_g = act[:, 2 * H:3 * H]
        o_g = act[:, 3 * H:4 * H]
        c_new = f_g * c + i_g * g_g
        h_new = o_g * jnp.tanh(c_new)
        return h_new, c_new

    t0 = chunk * Tc

    def step(t, carry):
        h_f, c_f, a_f, h_b, c_b, a_b = carry
        # Per-(t, b) accumulation weight = mask / len, computed in-kernel from
        # the per-row lengths (no (T*Bp, 1) mask array streamed from HBM).
        w_t = jnp.where(t0 + t < lens, inv_len, 0.0)              # (Bp, 1)
        # The two direction chains are independent; interleaving them lets each
        # hide the other's MXU / EUP latency on a single TensorCore.
        g_f = (gxf_ref[t].astype(jnp.float32) + b_f
               + jnp.dot(h_f.astype(jnp.bfloat16), whh_f_ref[...],
                         preferred_element_type=jnp.float32))
        g_b = (gxb_ref[t].astype(jnp.float32) + b_b
               + jnp.dot(h_b.astype(jnp.bfloat16), whh_b_ref[...],
                         preferred_element_type=jnp.float32))
        h_f, c_f = cell(g_f, c_f)
        h_b, c_b = cell(g_b, c_b)
        a_f = a_f + w_t * h_f
        a_b = a_b + w_t * h_b
        return h_f, c_f, a_f, h_b, c_b, a_b

    init = (hf_ref[...], cf_ref[...], af_ref[...],
            hb_ref[...], cb_ref[...], ab_ref[...])
    # Bounded unroll keeps vreg pressure in check for larger padded batches.
    unroll = True if Tc <= 8 else (4 if Bp <= 16 else 2)
    h_f, c_f, a_f, h_b, c_b, a_b = lax.fori_loop(0, Tc, step, init,
                                                 unroll=unroll)

    hf_ref[...] = h_f
    cf_ref[...] = c_f
    af_ref[...] = a_f
    hb_ref[...] = h_b
    cb_ref[...] = c_b
    ab_ref[...] = a_b

    @pl.when(chunk == pl.num_programs(0) - 1)
    def _finalize():
        out_ref[:, 0:H] = a_f
        out_ref[:, H:2 * H] = a_b


# ------------------------------ JAX wrapper -------------------------------- #

def init_decoder_params(key, in_feat):
    """Deterministic init mirroring nn.LSTM's uniform(-1/sqrt(H), 1/sqrt(H))."""
    H = in_feat
    stdv = 1.0 / math.sqrt(H)
    ks = jax.random.split(key, 8)

    def u(k, shape):
        return jax.random.uniform(k, shape, jnp.float32, -stdv, stdv)

    return dict(
        wih_f=u(ks[0], (4 * H, H)).T,                      # (D, 4H)
        whh_f=u(ks[1], (4 * H, H)).T,                      # (H, 4H)
        b_f=(u(ks[2], (4 * H,)) + u(ks[3], (4 * H,))).reshape(1, 4 * H),
        wih_b=u(ks[4], (4 * H, H)).T,
        whh_b=u(ks[5], (4 * H, H)).T,
        b_b=(u(ks[6], (4 * H,)) + u(ks[7], (4 * H,))).reshape(1, 4 * H),
    )


def decoder_forward(token_embeds, attention_mask, params, *, time_chunk=16):
    """token_embeds: (B, T, D) padded f32; attention_mask: (B, T) 1/0.

    Returns (B, 2*D): per-example mean over the valid time steps of the
    bidirectional LSTM output ([fwd half | bwd half]).
    """
    B, T, D = token_embeds.shape
    H = D
    G = 4 * H
    Gp = _round_up(G, 128)       # pad the packed gate block as a whole only
    Bp = _round_up(B, 16)        # align batch to the bf16 (16, 128) tile

    # Time-chunked streaming grid: VMEM stays O(Tc*Bp*4H) and the DMA of chunk
    # i+1 overlaps the recurrence of chunk i.
    Tc = _round_up(max(1, min(time_chunk, T)), 4)
    n_chunks = (T + Tc - 1) // Tc
    Tp = n_chunks * Tc

    lengths = jnp.maximum(jnp.sum(attention_mask.astype(jnp.int32), axis=1), 1)

    # Backward-direction input: reverse each sequence over its valid tokens
    # (packed-sequence semantics: the bwd LSTM starts at the last valid token).
    t_idx = jnp.arange(T)[None, :]
    rev_idx = jnp.clip(lengths[:, None] - 1 - t_idx, 0, T - 1)
    x_bwd = jnp.take_along_axis(token_embeds, rev_idx[:, :, None], axis=1)

    def to_time_major(x):                     # (B, T, D) -> (Tp*Bp, D) bf16
        x = jnp.pad(x, ((0, Bp - B), (0, Tp - T), (0, 0)))
        return jnp.transpose(x, (1, 0, 2)).reshape(Tp * Bp, D).astype(jnp.bfloat16)

    xf = to_time_major(token_embeds)
    xb = to_time_major(x_bwd)

    def pad_gates(a):                         # (..., 4H) -> (..., Gp)
        return jnp.pad(a, [(0, 0)] * (a.ndim - 1) + [(0, Gp - G)])

    wih_f = pad_gates(params["wih_f"]).astype(jnp.bfloat16)
    wih_b = pad_gates(params["wih_b"]).astype(jnp.bfloat16)
    whh_f = pad_gates(params["whh_f"]).astype(jnp.bfloat16)
    whh_b = pad_gates(params["whh_b"]).astype(jnp.bfloat16)
    b_f = pad_gates(params["b_f"])
    b_b = pad_gates(params["b_b"])

    # Per-row lengths + 1/len (pad rows get len=0 -> never accumulated).
    lens_col = jnp.pad(lengths, (0, Bp - B)).reshape(Bp, 1).astype(jnp.int32)
    inv_col = jnp.pad(1.0 / lengths.astype(jnp.float32),
                      (0, Bp - B)).reshape(Bp, 1)

    const = lambda c: (0, 0)
    x_map = lambda c: (c, 0)

    in_specs = [
        pl.BlockSpec((Bp, 1), const),                 # lengths
        pl.BlockSpec((Bp, 1), const),                 # 1/len
        pl.BlockSpec((Tc * Bp, D), x_map),            # xf chunk
        pl.BlockSpec((Tc * Bp, D), x_map),            # xb chunk
        pl.BlockSpec((D, Gp), const),                 # wih_f
        pl.BlockSpec((H, Gp), const),                 # whh_f
        pl.BlockSpec((1, Gp), const),                 # b_f
        pl.BlockSpec((D, Gp), const),                 # wih_b
        pl.BlockSpec((H, Gp), const),                 # whh_b
        pl.BlockSpec((1, Gp), const),                 # b_b
    ]
    out_spec = pl.BlockSpec((Bp, 2 * H), const)

    scratch_shapes = [
        pltpu.VMEM((Tc, Bp, Gp), jnp.bfloat16),       # gxf (hoisted x @ W_ih, fwd)
        pltpu.VMEM((Tc, Bp, Gp), jnp.bfloat16),       # gxb
        pltpu.VMEM((Bp, H), jnp.float32),             # h_f
        pltpu.VMEM((Bp, H), jnp.float32),             # c_f
        pltpu.VMEM((Bp, H), jnp.float32),             # acc_f
        pltpu.VMEM((Bp, H), jnp.float32),             # h_b
        pltpu.VMEM((Bp, H), jnp.float32),             # c_b
        pltpu.VMEM((Bp, H), jnp.float32),             # acc_b
    ]

    # Cost estimate: projection + recurrence matmuls, tanh-based activations,
    # HBM traffic + gx scratch write/read traffic (advisory for XLA).
    flops = 4 * Tp * Bp * Gp * (D + H)
    transcendentals = 2 * Tp * Bp * (Gp + H)
    bytes_accessed = int(
        (xf.size + xb.size) * 2
        + (wih_f.size + wih_b.size + whh_f.size + whh_b.size) * 2
        + (b_f.size + b_b.size + inv_col.size + lens_col.size) * 4
        + Bp * 2 * H * 4
        + 2 * 2 * Tp * Bp * Gp * 2)                   # gx scratch w + r, 2 dirs

    # VMEM budget derived from the actual buffers (double-buffered streamed
    # inputs), with headroom, capped below v7x's 64 MiB/TC physical VMEM.
    vmem_est = (2 * 2 * Tc * Bp * D * 2               # xf, xb (double buffered)
                + 2 * Tc * Bp * Gp * 2                # gx scratch (bf16)
                + 2 * 2 * (D + H) * Gp * 2            # weights (double buffered)
                + 4 * Gp * 4 + 6 * Bp * H * 4
                + 2 * Bp * 2 * H * 4 + 4 * Bp * 4)
    vmem_limit = int(min(56 * 1024 * 1024, max(8 * 1024 * 1024, 2 * vmem_est)))

    out_full = pl.pallas_call(
        _bilstm_mean_kernel,
        out_shape=jax.ShapeDtypeStruct((Bp, 2 * H), jnp.float32),
        grid_spec=pltpu.PrefetchScalarGridSpec(
            num_scalar_prefetch=0,
            grid=(n_chunks,),
            in_specs=in_specs,
            out_specs=out_spec,
            scratch_shapes=scratch_shapes),
        cost_estimate=pl.CostEstimate(flops=flops,
                                      transcendentals=transcendentals,
                                      bytes_accessed=bytes_accessed),
        compiler_params=pltpu.CompilerParams(
            dimension_semantics=("arbitrary",),
            vmem_limit_bytes=vmem_limit),
    )(lens_col, inv_col, xf, xb, wih_f, whh_f, b_f, wih_b, whh_b, b_b)

    return out_full[:B, :]


# --------------------------- pure-JAX reference ----------------------------- #

def decoder_reference(token_embeds, attention_mask, params):
    """Pure-JAX reference mirroring the kernel's bf16 matmul / scratch rounding."""
    B, T, D = token_embeds.shape
    H = D
    lengths = jnp.maximum(jnp.sum(attention_mask.astype(jnp.int32), axis=1), 1)

    def bf(a):
        return a.astype(jnp.bfloat16).astype(jnp.float32)

    hp = lax.Precision.HIGHEST

    def run(x, wih, whh, b):
        wih16, whh16 = bf(wih), bf(whh)
        # Mirror the kernel: x @ W_ih with bf16 operands / f32 accumulation,
        # result stored in bf16 (the kernel's gx scratch).
        gx = bf(jnp.einsum('btd,dg->btg', bf(x), wih16, precision=hp))

        def step(carry, gx_t):
            h, c = carry
            gates = gx_t + b + jnp.dot(bf(h), whh16, precision=hp)
            i = jax.nn.sigmoid(gates[:, :H])
            f = jax.nn.sigmoid(gates[:, H:2 * H])
            g = jnp.tanh(gates[:, 2 * H:3 * H])
            o = jax.nn.sigmoid(gates[:, 3 * H:])
            c = f * c + i * g
            h = o * jnp.tanh(c)
            return (h, c), h

        zeros = jnp.zeros((B, H), jnp.float32)
        _, hs = lax.scan(step, (zeros, zeros), jnp.transpose(gx, (1, 0, 2)))
        return jnp.transpose(hs, (1, 0, 2))                           # (B, T, H)

    t_idx = jnp.arange(T)[None, :]
    rev_idx = jnp.clip(lengths[:, None] - 1 - t_idx, 0, T - 1)
    x_bwd = jnp.take_along_axis(token_embeds, rev_idx[:, :, None], axis=1)

    hs_f = run(token_embeds, params["wih_f"], params["whh_f"], params["b_f"])
    hs_b = run(x_bwd, params["wih_b"], params["whh_b"], params["b_b"])
    m = attention_mask.astype(jnp.float32)[:, :, None]
    inv_len = (1.0 / lengths.astype(jnp.float32))[:, None]
    mean_f = jnp.sum(hs_f * m, axis=1) * inv_len
    mean_b = jnp.sum(hs_b * m, axis=1) * inv_len
    return jnp.concatenate([mean_f, mean_b], axis=-1)


# ----------------------------------- main ----------------------------------- #

if __name__ == "__main__":
    B, T, IN_FEAT = 2, 8, 32

    key = jax.random.PRNGKey(0)
    k_params, k_x = jax.random.split(key)

    params = init_decoder_params(k_params, IN_FEAT)

    token_embeds = jax.random.normal(k_x, (B, T, IN_FEAT), jnp.float32)
    # variable-length sequences (lengths 8 and 5), right-padded
    lengths = jnp.array([T, 5], dtype=jnp.int32)
    attention_mask = (jnp.arange(T)[None, :] < lengths[:, None]).astype(jnp.int32)
    token_embeds = token_embeds * attention_mask[:, :, None].astype(jnp.float32)

    # time_chunk=4 -> a 2-step streaming grid, exercising the cross-chunk
    # h/c/acc carry even at this small T.
    forward = jax.jit(functools.partial(decoder_forward, time_chunk=4))
    out = jax.block_until_ready(forward(token_embeds, attention_mask, params))
    ref = jax.block_until_ready(
        decoder_reference(token_embeds, attention_mask, params))

    assert out.shape == (B, 2 * IN_FEAT), out.shape
    # bf16 matmuls / bf16 gx storage in the kernel are mirrored in the
    # reference -> residual differences are accumulation-order level.
    assert jnp.allclose(out, ref, atol=2e-3, rtol=2e-3), (
        float(jnp.max(jnp.abs(out - ref))))

    print("KERNEL_OK")
</pallas_src>

<mosaic_0001>
module attributes {stable_mosaic.version = 11 : i64} {
  func.func @_bilstm_mean_kernel(%arg0: i32, %arg1: memref<16x1xi32, #tpu.memory_space<vmem>>, %arg2: memref<16x1xf32, #tpu.memory_space<vmem>>, %arg3: memref<64x32xbf16, #tpu.memory_space<vmem>>, %arg4: memref<64x32xbf16, #tpu.memory_space<vmem>>, %arg5: memref<32x128xbf16, #tpu.memory_space<vmem>>, %arg6: memref<32x128xbf16, #tpu.memory_space<vmem>>, %arg7: memref<1x128xf32, #tpu.memory_space<vmem>>, %arg8: memref<32x128xbf16, #tpu.memory_space<vmem>>, %arg9: memref<32x128xbf16, #tpu.memory_space<vmem>>, %arg10: memref<1x128xf32, #tpu.memory_space<vmem>>, %arg11: memref<16x64xf32, #tpu.memory_space<vmem>>, %arg12: memref<4x16x128xbf16, #tpu.memory_space<vmem>>, %arg13: memref<4x16x128xbf16, #tpu.memory_space<vmem>>, %arg14: memref<16x32xf32, #tpu.memory_space<vmem>>, %arg15: memref<16x32xf32, #tpu.memory_space<vmem>>, %arg16: memref<16x32xf32, #tpu.memory_space<vmem>>, %arg17: memref<16x32xf32, #tpu.memory_space<vmem>>, %arg18: memref<16x32xf32, #tpu.memory_space<vmem>>, %arg19: memref<16x32xf32, #tpu.memory_space<vmem>>) attributes {dimension_semantics = [#tpu.dimension_semantics<arbitrary>], iteration_bounds = array<i64: 2>, scalar_prefetch = 0 : i64, scratch_operands = 8 : i64, tpu.core_type = #tpu.core_type<tc>, window_params = [{pipeline_mode = #tpu.pipeline_mode<synchronous>, transform_indices = @transform_0, window_bounds = array<i64: 16, 1>}, {pipeline_mode = #tpu.pipeline_mode<synchronous>, transform_indices = @transform_1, window_bounds = array<i64: 16, 1>}, {transform_indices = @transform_2, window_bounds = array<i64: 64, 32>}, {transform_indices = @transform_3, window_bounds = array<i64: 64, 32>}, {pipeline_mode = #tpu.pipeline_mode<synchronous>, transform_indices = @transform_4, window_bounds = array<i64: 32, 128>}, {pipeline_mode = #tpu.pipeline_mode<synchronous>, transform_indices = @transform_5, window_bounds = array<i64: 32, 128>}, {pipeline_mode = #tpu.pipeline_mode<synchronous>, transform_indices = @transform_6, window_bounds = array<i64: 1, 128>}, {pipeline_mode = #tpu.pipeline_mode<synchronous>, transform_indices = @transform_7, window_bounds = array<i64: 32, 128>}, {pipeline_mode = #tpu.pipeline_mode<synchronous>, transform_indices = @transform_8, window_bounds = array<i64: 32, 128>}, {pipeline_mode = #tpu.pipeline_mode<synchronous>, transform_indices = @transform_9, window_bounds = array<i64: 1, 128>}, {pipeline_mode = #tpu.pipeline_mode<synchronous>, transform_indices = @transform_10, window_bounds = array<i64: 16, 64>}]} {
    %c0_i32 = arith.constant 0 : i32
    %0 = arith.cmpi eq, %arg0, %c0_i32 : i32
    %1 = arith.extui %0 : i1 to i32
    %c0_i32_0 = arith.constant 0 : i32
    %2 = arith.cmpi ne, %1, %c0_i32_0 : i32
    scf.if %2 {
      %cst_134 = arith.constant 0.000000e+00 : f32
      %343 = vector.broadcast %cst_134 : f32 to vector<16x32xf32>
      %c0_135 = arith.constant 0 : index
      %c0_136 = arith.constant 0 : index
      %344 = vector.load %arg14[%c0_135, %c0_136] : memref<16x32xf32, #tpu.memory_space<vmem>>, vector<16x32xf32>
      tpu.vector_store %arg14[%c0_135, %c0_136], %343 {strides = array<i32>} : memref<16x32xf32, #tpu.memory_space<vmem>>, vector<16x32xf32>,
      %cst_137 = arith.constant 0.000000e+00 : f32
      %345 = vector.broadcast %cst_137 : f32 to vector<16x32xf32>
      %c0_138 = arith.constant 0 : index
      %c0_139 = arith.constant 0 : index
      %346 = vector.load %arg15[%c0_138, %c0_139] : memref<16x32xf32, #tpu.memory_space<vmem>>, vector<16x32xf32>
      tpu.vector_store %arg15[%c0_138, %c0_139], %345 {strides = array<i32>} : memref<16x32xf32, #tpu.memory_space<vmem>>, vector<16x32xf32>,
      %cst_140 = arith.constant 0.000000e+00 : f32
      %347 = vector.broadcast %cst_140 : f32 to vector<16x32xf32>
      %c0_141 = arith.constant 0 : index
      %c0_142 = arith.constant 0 : index
      %348 = vector.load %arg16[%c0_141, %c0_142] : memref<16x32xf32, #tpu.memory_space<vmem>>, vector<16x32xf32>
      tpu.vector_store %arg16[%c0_141, %c0_142], %347 {strides = array<i32>} : memref<16x32xf32, #tpu.memory_space<vmem>>, vector<16x32xf32>,
      %cst_143 = arith.constant 0.000000e+00 : f32
      %349 = vector.broadcast %cst_143 : f32 to vector<16x32xf32>
      %c0_144 = arith.constant 0 : index
      %c0_145 = arith.constant 0 : index
      %350 = vector.load %arg17[%c0_144, %c0_145] : memref<16x32xf32, #tpu.memory_space<vmem>>, vector<16x32xf32>
      tpu.vector_store %arg17[%c0_144, %c0_145], %349 {strides = array<i32>} : memref<16x32xf32, #tpu.memory_space<vmem>>, vector<16x32xf32>,
      %cst_146 = arith.constant 0.000000e+00 : f32
      %351 = vector.broadcast %cst_146 : f32 to vector<16x32xf32>
      %c0_147 = arith.constant 0 : index
      %c0_148 = arith.constant 0 : index
      %352 = vector.load %arg18[%c0_147, %c0_148] : memref<16x32xf32, #tpu.memory_space<vmem>>, vector<16x32xf32>
      tpu.vector_store %arg18[%c0_147, %c0_148], %351 {strides = array<i32>} : memref<16x32xf32, #tpu.memory_space<vmem>>, vector<16x32xf32>,
      %cst_149 = arith.constant 0.000000e+00 : f32
      %353 = vector.broadcast %cst_149 : f32 to vector<16x32xf32>
      %c0_150 = arith.constant 0 : index
      %c0_151 = arith.constant 0 : index
      %354 = vector.load %arg19[%c0_150, %c0_151] : memref<16x32xf32, #tpu.memory_space<vmem>>, vector<16x32xf32>
      tpu.vector_store %arg19[%c0_150, %c0_151], %353 {strides = array<i32>} : memref<16x32xf32, #tpu.memory_space<vmem>>, vector<16x32xf32>,
    } else {
    }
    %c0 = arith.constant 0 : index
    %c0_1 = arith.constant 0 : index
    %3 = vector.load %arg3[%c0, %c0_1] : memref<64x32xbf16, #tpu.memory_space<vmem>>, vector<64x32xbf16>
    %c0_2 = arith.constant 0 : index
    %c0_3 = arith.constant 0 : index
    %4 = vector.load %arg5[%c0_2, %c0_3] : memref<32x128xbf16, #tpu.memory_space<vmem>>, vector<32x128xbf16>
    %cst = arith.constant dense<0.000000e+00> : vector<64x128xf32>
    %5 = tpu.matmul %3, %4, %cst {dimension_numbers = #tpu.dot_dimension_numbers<[1], [0], [0], [1], [0, 0, 1, 1], [], []>} : vector<64x32xbf16>, vector<32x128xbf16>, vector<64x128xf32> -> vector<64x128xf32>
    %c0_4 = arith.constant 0 : index
    %c0_5 = arith.constant 0 : index
    %6 = vector.load %arg4[%c0_4, %c0_5] : memref<64x32xbf16, #tpu.memory_space<vmem>>, vector<64x32xbf16>
    %c0_6 = arith.constant 0 : index
    %c0_7 = arith.constant 0 : index
    %7 = vector.load %arg8[%c0_6, %c0_7] : memref<32x128xbf16, #tpu.memory_space<vmem>>, vector<32x128xbf16>
    %cst_8 = arith.constant dense<0.000000e+00> : vector<64x128xf32>
    %8 = tpu.matmul %6, %7, %cst_8 {dimension_numbers = #tpu.dot_dimension_numbers<[1], [0], [0], [1], [0, 0, 1, 1], [], []>} : vector<64x32xbf16>, vector<32x128xbf16>, vector<64x128xf32> -> vector<64x128xf32>
    %9 = vector.extract_strided_slice %5 {offsets = [0, 0], sizes = [16, 128], strides = [1, 1]} : vector<64x128xf32> to vector<16x128xf32>
    %10 = arith.truncf %9 : vector<16x128xf32> to vector<16x128xbf16>
    %c0_9 = arith.constant 0 : index
    %c0_10 = arith.constant 0 : index
    %c0_11 = arith.constant 0 : index
    %11 = vector.load %arg12[%c0_9, %c0_10, %c0_11] : memref<4x16x128xbf16, #tpu.memory_space<vmem>>, vector<1x16x128xbf16>
    %12 = vector.shape_cast %11 : vector<1x16x128xbf16> to vector<16x128xbf16>
    %13 = vector.shape_cast %10 : vector<16x128xbf16> to vector<1x16x128xbf16>
    tpu.vector_store %arg12[%c0_9, %c0_10, %c0_11], %13 {strides = array<i32>} : memref<4x16x128xbf16, #tpu.memory_space<vmem>>, vector<1x16x128xbf16>,
    %14 = vector.extract_strided_slice %8 {offsets = [0, 0], sizes = [16, 128], strides = [1, 1]} : vector<64x128xf32> to vector<16x128xf32>
    %15 = arith.truncf %14 : vector<16x128xf32> to vector<16x128xbf16>
    %c0_12 = arith.constant 0 : index
    %c0_13 = arith.constant 0 : index
    %c0_14 = arith.constant 0 : index
    %16 = vector.load %arg13[%c0_12, %c0_13, %c0_14] : memref<4x16x128xbf16, #tpu.memory_space<vmem>>, vector<1x16x128xbf16>
    %17 = vector.shape_cast %16 : vector<1x16x128xbf16> to vector<16x128xbf16>
    %18 = vector.shape_cast %15 : vector<16x128xbf16> to vector<1x16x128xbf16>
    tpu.vector_store %arg13[%c0_12, %c0_13, %c0_14], %18 {strides = array<i32>} : memref<4x16x128xbf16, #tpu.memory_space<vmem>>, vector<1x16x128xbf16>,
    %19 = vector.extract_strided_slice %5 {offsets = [16, 0], sizes = [16, 128], strides = [1, 1]} : vector<64x128xf32> to vector<16x128xf32>
    %20 = arith.truncf %19 : vector<16x128xf32> to vector<16x128xbf16>
    %c1 = arith.constant 1 : index
    %c0_15 = arith.constant 0 : index
    %c0_16 = arith.constant 0 : index
    %21 = vector.load %arg12[%c1, %c0_15, %c0_16] : memref<4x16x128xbf16, #tpu.memory_space<vmem>>, vector<1x16x128xbf16>
    %22 = vector.shape_cast %21 : vector<1x16x128xbf16> to vector<16x128xbf16>
    %23 = vector.shape_cast %20 : vector<16x128xbf16> to vector<1x16x128xbf16>
    tpu.vector_store %arg12[%c1, %c0_15, %c0_16], %23 {strides = array<i32>} : memref<4x16x128xbf16, #tpu.memory_space<vmem>>, vector<1x16x128xbf16>,
    %24 = vector.extract_strided_slice %8 {offsets = [16, 0], sizes = [16, 128], strides = [1, 1]} : vector<64x128xf32> to vector<16x128xf32>
    %25 = arith.truncf %24 : vector<16x128xf32> to vector<16x128xbf16>
    %c1_17 = arith.constant 1 : index
    %c0_18 = arith.constant 0 : index
    %c0_19 = arith.constant 0 : index
    %26 = vector.load %arg13[%c1_17, %c0_18, %c0_19] : memref<4x16x128xbf16, #tpu.memory_space<vmem>>, vector<1x16x128xbf16>
    %27 = vector.shape_cast %26 : vector<1x16x128xbf16> to vector<16x128xbf16>
    %28 = vector.shape_cast %25 : vector<16x128xbf16> to vector<1x16x128xbf16>
    tpu.vector_store %arg13[%c1_17, %c0_18, %c0_19], %28 {strides = array<i32>} : memref<4x16x128xbf16, #tpu.memory_space<vmem>>, vector<1x16x128xbf16>,
    %29 = vector.extract_strided_slice %5 {offsets = [32, 0], sizes = [16, 128], strides = [1, 1]} : vector<64x128xf32> to vector<16x128xf32>
    %30 = arith.truncf %29 : vector<16x128xf32> to vector<16x128xbf16>
    %c2 = arith.constant 2 : index
    %c0_20 = arith.constant 0 : index
    %c0_21 = arith.constant 0 : index
    %31 = vector.load %arg12[%c2, %c0_20, %c0_21] : memref<4x16x128xbf16, #tpu.memory_space<vmem>>, vector<1x16x128xbf16>
    %32 = vector.shape_cast %31 : vector<1x16x128xbf16> to vector<16x128xbf16>
    %33 = vector.shape_cast %30 : vector<16x128xbf16> to vector<1x16x128xbf16>
    tpu.vector_store %arg12[%c2, %c0_20, %c0_21], %33 {strides = array<i32>} : memref<4x16x128xbf16, #tpu.memory_space<vmem>>, vector<1x16x128xbf16>,
    %34 = vector.extract_strided_slice %8 {offsets = [32, 0], sizes = [16, 128], strides = [1, 1]} : vector<64x128xf32> to vector<16x128xf32>
    %35 = arith.truncf %34 : vector<16x128xf32> to vector<16x128xbf16>
    %c2_22 = arith.constant 2 : index
    %c0_23 = arith.constant 0 : index
    %c0_24 = arith.constant 0 : index
    %36 = vector.load %arg13[%c2_22, %c0_23, %c0_24] : memref<4x16x128xbf16, #tpu.memory_space<vmem>>, vector<1x16x128xbf16>
    %37 = vector.shape_cast %36 : vector<1x16x128xbf16> to vector<16x128xbf16>
    %38 = vector.shape_cast %35 : vector<16x128xbf16> to vector<1x16x128xbf16>
    tpu.vector_store %arg13[%c2_22, %c0_23, %c0_24], %38 {strides = array<i32>} : memref<4x16x128xbf16, #tpu.memory_space<vmem>>, vector<1x16x128xbf16>,
    %39 = vector.extract_strided_slice %5 {offsets = [48, 0], sizes = [16, 128], strides = [1, 1]} : vector<64x128xf32> to vector<16x128xf32>
    %40 = arith.truncf %39 : vector<16x128xf32> to vector<16x128xbf16>
    %c3 = arith.constant 3 : index
    %c0_25 = arith.constant 0 : index
    %c0_26 = arith.constant 0 : index
    %41 = vector.load %arg12[%c3, %c0_25, %c0_26] : memref<4x16x128xbf16, #tpu.memory_space<vmem>>, vector<1x16x128xbf16>
    %42 = vector.shape_cast %41 : vector<1x16x128xbf16> to vector<16x128xbf16>
    %43 = vector.shape_cast %40 : vector<16x128xbf16> to vector<1x16x128xbf16>
    tpu.vector_store %arg12[%c3, %c0_25, %c0_26], %43 {strides = array<i32>} : memref<4x16x128xbf16, #tpu.memory_space<vmem>>, vector<1x16x128xbf16>,
    %44 = vector.extract_strided_slice %8 {offsets = [48, 0], sizes = [16, 128], strides = [1, 1]} : vector<64x128xf32> to vector<16x128xf32>
    %45 = arith.truncf %44 : vector<16x128xf32> to vector<16x128xbf16>
    %c3_27 = arith.constant 3 : index
    %c0_28 = arith.constant 0 : index
    %c0_29 = arith.constant 0 : index
    %46 = vector.load %arg13[%c3_27, %c0_28, %c0_29] : memref<4x16x128xbf16, #tpu.memory_space<vmem>>, vector<1x16x128xbf16>
    %47 = vector.shape_cast %46 : vector<1x16x128xbf16> to vector<16x128xbf16>
    %48 = vector.shape_cast %45 : vector<16x128xbf16> to vector<1x16x128xbf16>
    tpu.vector_store %arg13[%c3_27, %c0_28, %c0_29], %48 {strides = array<i32>} : memref<4x16x128xbf16, #tpu.memory_space<vmem>>, vector<1x16x128xbf16>,
    %c0_30 = arith.constant 0 : index
    %c0_31 = arith.constant 0 : index
    %49 = vector.load %arg7[%c0_30, %c0_31] : memref<1x128xf32, #tpu.memory_space<vmem>>, vector<1x128xf32>
    %c0_32 = arith.constant 0 : index
    %c0_33 = arith.constant 0 : index
    %50 = vector.load %arg10[%c0_32, %c0_33] : memref<1x128xf32, #tpu.memory_space<vmem>>, vector<1x128xf32>
    %c0_34 = arith.constant 0 : index
    %c0_35 = arith.constant 0 : index
    %51 = vector.load %arg1[%c0_34, %c0_35] : memref<16x1xi32, #tpu.memory_space<vmem>>, vector<16x1xi32>
    %c0_36 = arith.constant 0 : index
    %c0_37 = arith.constant 0 : index
    %52 = vector.load %arg2[%c0_36, %c0_37] : memref<16x1xf32, #tpu.memory_space<vmem>>, vector<16x1xf32>
    %53 = tpu.iota {dimensions = array<i32: 1>} : vector<16x128xi32>
    %c64_i32 = arith.constant 64 : i32
    %54 = vector.broadcast %c64_i32 : i32 to vector<16x128xi32>
    %55 = arith.cmpi sge, %53, %54 : vector<16x128xi32>
    %c96_i32 = arith.constant 96 : i32
    %56 = vector.broadcast %c96_i32 : i32 to vector<16x128xi32>
    %57 = arith.cmpi slt, %53, %56 : vector<16x128xi32>
    %58 = arith.andi %55, %57 : vector<16x128xi1>
    %c4_i32 = arith.constant 4 : i32
    %59 = arith.muli %arg0, %c4_i32 : i32
    %c0_38 = arith.constant 0 : index
    %c0_39 = arith.constant 0 : index
    %60 = vector.load %arg14[%c0_38, %c0_39] : memref<16x32xf32, #tpu.memory_space<vmem>>, vector<16x32xf32>
    %c0_40 = arith.constant 0 : index
    %c0_41 = arith.constant 0 : index
    %61 = vector.load %arg15[%c0_40, %c0_41] : memref<16x32xf32, #tpu.memory_space<vmem>>, vector<16x32xf32>
    %c0_42 = arith.constant 0 : index
    %c0_43 = arith.constant 0 : index
    %62 = vector.load %arg16[%c0_42, %c0_43] : memref<16x32xf32, #tpu.memory_space<vmem>>, vector<16x32xf32>
    %c0_44 = arith.constant 0 : index
    %c0_45 = arith.constant 0 : index
    %63 = vector.load %arg17[%c0_44, %c0_45] : memref<16x32xf32, #tpu.memory_space<vmem>>, vector<16x32xf32>
    %c0_46 = arith.constant 0 : index
    %c0_47 = arith.constant 0 : index
    %64 = vector.load %arg18[%c0_46, %c0_47] : memref<16x32xf32, #tpu.memory_space<vmem>>, vector<16x32xf32>
    %c0_48 = arith.constant 0 : index
    %c0_49 = arith.constant 0 : index
    %65 = vector.load %arg19[%c0_48, %c0_49] : memref<16x32xf32, #tpu.memory_space<vmem>>, vector<16x32xf32>
    %c0_i32_50 = arith.constant 0 : i32
    %66 = arith.addi %59, %c0_i32_50 : i32
    %67 = vector.broadcast %66 : i32 to vector<16x1xi32>
    %68 = arith.cmpi slt, %67, %51 : vector<16x1xi32>
    %cst_51 = arith.constant 0.000000e+00 : f32
    %69 = vector.broadcast %cst_51 : f32 to vector<16x1xf32>
    %70 = arith.select %68, %52, %69 : vector<16x1xi1>, vector<16x1xf32>
    %71 = arith.index_cast %c0_i32_50 : i32 to index
    %c0_52 = arith.constant 0 : index
    %c0_53 = arith.constant 0 : index
    %72 = vector.load %arg12[%71, %c0_52, %c0_53] : memref<4x16x128xbf16, #tpu.memory_space<vmem>>, vector<1x16x128xbf16>
    %73 = vector.shape_cast %72 : vector<1x16x128xbf16> to vector<16x128xbf16>
    %74 = arith.extf %73 : vector<16x128xbf16> to vector<16x128xf32>
    %75 = vector.broadcast %49 : vector<1x128xf32> to vector<16x128xf32>
    %76 = arith.addf %74, %75 : vector<16x128xf32>
    %77 = arith.truncf %60 : vector<16x32xf32> to vector<16x32xbf16>
    %c0_54 = arith.constant 0 : index
    %c0_55 = arith.constant 0 : index
    %78 = vector.load %arg6[%c0_54, %c0_55] : memref<32x128xbf16, #tpu.memory_space<vmem>>, vector<32x128xbf16>
    %cst_56 = arith.constant dense<0.000000e+00> : vector<16x128xf32>
    %79 = tpu.matmul %77, %78, %cst_56 {dimension_numbers = #tpu.dot_dimension_numbers<[1], [0], [0], [1], [0, 0, 1, 1], [], []>} : vector<16x32xbf16>, vector<32x128xbf16>, vector<16x128xf32> -> vector<16x128xf32>
    %80 = arith.addf %76, %79 : vector<16x128xf32>
    %81 = arith.index_cast %c0_i32_50 : i32 to index
    %c0_57 = arith.constant 0 : index
    %c0_58 = arith.constant 0 : index
    %82 = vector.load %arg13[%81, %c0_57, %c0_58] : memref<4x16x128xbf16, #tpu.memory_space<vmem>>, vector<1x16x128xbf16>
    %83 = vector.shape_cast %82 : vector<1x16x128xbf16> to vector<16x128xbf16>
    %84 = arith.extf %83 : vector<16x128xbf16> to vector<16x128xf32>
    %85 = vector.broadcast %50 : vector<1x128xf32> to vector<16x128xf32>
    %86 = arith.addf %84, %85 : vector<16x128xf32>
    %87 = arith.truncf %63 : vector<16x32xf32> to vector<16x32xbf16>
    %c0_59 = arith.constant 0 : index
    %c0_60 = arith.constant 0 : index
    %88 = vector.load %arg9[%c0_59, %c0_60] : memref<32x128xbf16, #tpu.memory_space<vmem>>, vector<32x128xbf16>
    %cst_61 = arith.constant dense<0.000000e+00> : vector<16x128xf32>
    %89 = tpu.matmul %87, %88, %cst_61 {dimension_numbers = #tpu.dot_dimension_numbers<[1], [0], [0], [1], [0, 0, 1, 1], [], []>} : vector<16x32xbf16>, vector<32x128xbf16>, vector<16x128xf32> -> vector<16x128xf32>
    %90 = arith.addf %86, %89 : vector<16x128xf32>
    %cst_62 = arith.constant 5.000000e-01 : f32
    %91 = vector.broadcast %cst_62 : f32 to vector<16x128xf32>
    %92 = arith.mulf %91, %80 : vector<16x128xf32>
    %93 = arith.select %58, %80, %92 : vector<16x128xi1>, vector<16x128xf32>
    %94 = math.tanh %93 : vector<16x128xf32>
    %cst_63 = arith.constant 5.000000e-01 : f32
    %95 = vector.broadcast %cst_63 : f32 to vector<16x128xf32>
    %96 = arith.mulf %95, %94 : vector<16x128xf32>
    %cst_64 = arith.constant 5.000000e-01 : f32
    %97 = vector.broadcast %cst_64 : f32 to vector<16x128xf32>
    %98 = arith.addf %97, %96 : vector<16x128xf32>
    %99 = arith.select %58, %94, %98 : vector<16x128xi1>, vector<16x128xf32>
    %100 = vector.extract_strided_slice %99 {offsets = [0, 0], sizes = [16, 32], strides = [1, 1]} : vector<16x128xf32> to vector<16x32xf32>
    %101 = vector.extract_strided_slice %99 {offsets = [0, 32], sizes = [16, 32], strides = [1, 1]} : vector<16x128xf32> to vector<16x32xf32>
    %102 = vector.extract_strided_slice %99 {offsets = [0, 64], sizes = [16, 32], strides = [1, 1]} : vector<16x128xf32> to vector<16x32xf32>
    %103 = vector.extract_strided_slice %99 {offsets = [0, 96], sizes = [16, 32], strides = [1, 1]} : vector<16x128xf32> to vector<16x32xf32>
    %104 = arith.mulf %101, %61 : vector<16x32xf32>
    %105 = arith.mulf %100, %102 : vector<16x32xf32>
    %106 = arith.addf %104, %105 : vector<16x32xf32>
    %107 = math.tanh %106 : vector<16x32xf32>
    %108 = arith.mulf %103, %107 : vector<16x32xf32>
    %cst_65 = arith.constant 5.000000e-01 : f32
    %109 = vector.broadcast %cst_65 : f32 to vector<16x128xf32>
    %110 = arith.mulf %109, %90 : vector<16x128xf32>
    %111 = arith.select %58, %90, %110 : vector<16x128xi1>, vector<16x128xf32>
    %112 = math.tanh %111 : vector<16x128xf32>
    %cst_66 = arith.constant 5.000000e-01 : f32
    %113 = vector.broadcast %cst_66 : f32 to vector<16x128xf32>
    %114 = arith.mulf %113, %112 : vector<16x128xf32>
    %cst_67 = arith.constant 5.000000e-01 : f32
    %115 = vector.broadcast %cst_67 : f32 to vector<16x128xf32>
    %116 = arith.addf %115, %114 : vector<16x128xf32>
    %117 = arith.select %58, %112, %116 : vector<16x128xi1>, vector<16x128xf32>
    %118 = vector.extract_strided_slice %117 {offsets = [0, 0], sizes = [16, 32], strides = [1, 1]} : vector<16x128xf32> to vector<16x32xf32>
    %119 = vector.extract_strided_slice %117 {offsets = [0, 32], sizes = [16, 32], strides = [1, 1]} : vector<16x128xf32> to vector<16x32xf32>
    %120 = vector.extract_strided_slice %117 {offsets = [0, 64], sizes = [16, 32], strides = [1, 1]} : vector<16x128xf32> to vector<16x32xf32>
    %121 = vector.extract_strided_slice %117 {offsets = [0, 96], sizes = [16, 32], strides = [1, 1]} : vector<16x128xf32> to vector<16x32xf32>
    %122 = arith.mulf %119, %64 : vector<16x32xf32>
    %123 = arith.mulf %118, %120 : vector<16x32xf32>
    %124 = arith.addf %122, %123 : vector<16x32xf32>
    %125 = math.tanh %124 : vector<16x32xf32>
    %126 = arith.mulf %121, %125 : vector<16x32xf32>
    %127 = vector.broadcast %70 : vector<16x1xf32> to vector<16x32xf32>
    %128 = arith.mulf %127, %108 : vector<16x32xf32>
    %129 = arith.addf %62, %128 : vector<16x32xf32>
    %130 = vector.broadcast %70 : vector<16x1xf32> to vector<16x32xf32>
    %131 = arith.mulf %130, %126 : vector<16x32xf32>
    %132 = arith.addf %65, %131 : vector<16x32xf32>
    %c1_i32 = arith.constant 1 : i32
    %133 = arith.addi %59, %c1_i32 : i32
    %134 = vector.broadcast %133 : i32 to vector<16x1xi32>
    %135 = arith.cmpi slt, %134, %51 : vector<16x1xi32>
    %cst_68 = arith.constant 0.000000e+00 : f32
    %136 = vector.broadcast %cst_68 : f32 to vector<16x1xf32>
    %137 = arith.select %135, %52, %136 : vector<16x1xi1>, vector<16x1xf32>
    %138 = arith.index_cast %c1_i32 : i32 to index
    %c0_69 = arith.constant 0 : index
    %c0_70 = arith.constant 0 : index
    %139 = vector.load %arg12[%138, %c0_69, %c0_70] : memref<4x16x128xbf16, #tpu.memory_space<vmem>>, vector<1x16x128xbf16>
    %140 = vector.shape_cast %139 : vector<1x16x128xbf16> to vector<16x128xbf16>
    %141 = arith.extf %140 : vector<16x128xbf16> to vector<16x128xf32>
    %142 = vector.broadcast %49 : vector<1x128xf32> to vector<16x128xf32>
    %143 = arith.addf %141, %142 : vector<16x128xf32>
    %144 = arith.truncf %108 : vector<16x32xf32> to vector<16x32xbf16>
    %c0_71 = arith.constant 0 : index
    %c0_72 = arith.constant 0 : index
    %145 = vector.load %arg6[%c0_71, %c0_72] : memref<32x128xbf16, #tpu.memory_space<vmem>>, vector<32x128xbf16>
    %cst_73 = arith.constant dense<0.000000e+00> : vector<16x128xf32>
    %146 = tpu.matmul %144, %145, %cst_73 {dimension_numbers = #tpu.dot_dimension_numbers<[1], [0], [0], [1], [0, 0, 1, 1], [], []>} : vector<16x32xbf16>, vector<32x128xbf16>, vector<16x128xf32> -> vector<16x128xf32>
    %147 = arith.addf %143, %146 : vector<16x128xf32>
    %148 = arith.index_cast %c1_i32 : i32 to index
    %c0_74 = arith.constant 0 : index
    %c0_75 = arith.constant 0 : index
    %149 = vector.load %arg13[%148, %c0_74, %c0_75] : memref<4x16x128xbf16, #tpu.memory_space<vmem>>, vector<1x16x128xbf16>
    %150 = vector.shape_cast %149 : vector<1x16x128xbf16> to vector<16x128xbf16>
    %151 = arith.extf %150 : vector<16x128xbf16> to vector<16x128xf32>
    %152 = vector.broadcast %50 : vector<1x128xf32> to vector<16x128xf32>
    %153 = arith.addf %151, %152 : vector<16x128xf32>
    %154 = arith.truncf %126 : vector<16x32xf32> to vector<16x32xbf16>
    %c0_76 = arith.constant 0 : index
    %c0_77 = arith.constant 0 : index
    %155 = vector.load %arg9[%c0_76, %c0_77] : memref<32x128xbf16, #tpu.memory_space<vmem>>, vector<32x128xbf16>
    %cst_78 = arith.constant dense<0.000000e+00> : vector<16x128xf32>
    %156 = tpu.matmul %154, %155, %cst_78 {dimension_numbers = #tpu.dot_dimension_numbers<[1], [0], [0], [1], [0, 0, 1, 1], [], []>} : vector<16x32xbf16>, vector<32x128xbf16>, vector<16x128xf32> -> vector<16x128xf32>
    %157 = arith.addf %153, %156 : vector<16x128xf32>
    %cst_79 = arith.constant 5.000000e-01 : f32
    %158 = vector.broadcast %cst_79 : f32 to vector<16x128xf32>
    %159 = arith.mulf %158, %147 : vector<16x128xf32>
    %160 = arith.select %58, %147, %159 : vector<16x128xi1>, vector<16x128xf32>
    %161 = math.tanh %160 : vector<16x128xf32>
    %cst_80 = arith.constant 5.000000e-01 : f32
    %162 = vector.broadcast %cst_80 : f32 to vector<16x128xf32>
    %163 = arith.mulf %162, %161 : vector<16x128xf32>
    %cst_81 = arith.constant 5.000000e-01 : f32
    %164 = vector.broadcast %cst_81 : f32 to vector<16x128xf32>
    %165 = arith.addf %164, %163 : vector<16x128xf32>
    %166 = arith.select %58, %161, %165 : vector<16x128xi1>, vector<16x128xf32>
    %167 = vector.extract_strided_slice %166 {offsets = [0, 0], sizes = [16, 32], strides = [1, 1]} : vector<16x128xf32> to vector<16x32xf32>
    %168 = vector.extract_strided_slice %166 {offsets = [0, 32], sizes = [16, 32], strides = [1, 1]} : vector<16x128xf32> to vector<16x32xf32>
    %169 = vector.extract_strided_slice %166 {offsets = [0, 64], sizes = [16, 32], strides = [1, 1]} : vector<16x128xf32> to vector<16x32xf32>
    %170 = vector.extract_strided_slice %166 {offsets = [0, 96], sizes = [16, 32], strides = [1, 1]} : vector<16x128xf32> to vector<16x32xf32>
    %171 = arith.mulf %168, %106 : vector<16x32xf32>
    %172 = arith.mulf %167, %169 : vector<16x32xf32>
    %173 = arith.addf %171, %172 : vector<16x32xf32>
    %174 = math.tanh %173 : vector<16x32xf32>
    %175 = arith.mulf %170, %174 : vector<16x32xf32>
    %cst_82 = arith.constant 5.000000e-01 : f32
    %176 = vector.broadcast %cst_82 : f32 to vector<16x128xf32>
    %177 = arith.mulf %176, %157 : vector<16x128xf32>
    %178 = arith.select %58, %157, %177 : vector<16x128xi1>, vector<16x128xf32>
    %179 = math.tanh %178 : vector<16x128xf32>
    %cst_83 = arith.constant 5.000000e-01 : f32
    %180 = vector.broadcast %cst_83 : f32 to vector<16x128xf32>
    %181 = arith.mulf %180, %179 : vector<16x128xf32>
    %cst_84 = arith.constant 5.000000e-01 : f32
    %182 = vector.broadcast %cst_84 : f32 to vector<16x128xf32>
    %183 = arith.addf %182, %181 : vector<16x128xf32>
    %184 = arith.select %58, %179, %183 : vector<16x128xi1>, vector<16x128xf32>
    %185 = vector.extract_strided_slice %184 {offsets = [0, 0], sizes = [16, 32], strides = [1, 1]} : vector<16x128xf32> to vector<16x32xf32>
    %186 = vector.extract_strided_slice %184 {offsets = [0, 32], sizes = [16, 32], strides = [1, 1]} : vector<16x128xf32> to vector<16x32xf32>
    %187 = vector.extract_strided_slice %184 {offsets = [0, 64], sizes = [16, 32], strides = [1, 1]} : vector<16x128xf32> to vector<16x32xf32>
    %188 = vector.extract_strided_slice %184 {offsets = [0, 96], sizes = [16, 32], strides = [1, 1]} : vector<16x128xf32> to vector<16x32xf32>
    %189 = arith.mulf %186, %124 : vector<16x32xf32>
    %190 = arith.mulf %185, %187 : vector<16x32xf32>
    %191 = arith.addf %189, %190 : vector<16x32xf32>
    %192 = math.tanh %191 : vector<16x32xf32>
    %193 = arith.mulf %188, %192 : vector<16x32xf32>
    %194 = vector.broadcast %137 : vector<16x1xf32> to vector<16x32xf32>
    %195 = arith.mulf %194, %175 : vector<16x32xf32>
    %196 = arith.addf %129, %195 : vector<16x32xf32>
    %197 = vector.broadcast %137 : vector<16x1xf32> to vector<16x32xf32>
    %198 = arith.mulf %197, %193 : vector<16x32xf32>
    %199 = arith.addf %132, %198 : vector<16x32xf32>
    %c2_i32 = arith.constant 2 : i32
    %200 = arith.addi %59, %c2_i32 : i32
    %201 = vector.broadcast %200 : i32 to vector<16x1xi32>
    %202 = arith.cmpi slt, %201, %51 : vector<16x1xi32>
    %cst_85 = arith.constant 0.000000e+00 : f32
    %203 = vector.broadcast %cst_85 : f32 to vector<16x1xf32>
    %204 = arith.select %202, %52, %203 : vector<16x1xi1>, vector<16x1xf32>
    %205 = arith.index_cast %c2_i32 : i32 to index
    %c0_86 = arith.constant 0 : index
    %c0_87 = arith.constant 0 : index
    %206 = vector.load %arg12[%205, %c0_86, %c0_87] : memref<4x16x128xbf16, #tpu.memory_space<vmem>>, vector<1x16x128xbf16>
    %207 = vector.shape_cast %206 : vector<1x16x128xbf16> to vector<16x128xbf16>
    %208 = arith.extf %207 : vector<16x128xbf16> to vector<16x128xf32>
    %209 = vector.broadcast %49 : vector<1x128xf32> to vector<16x128xf32>
    %210 = arith.addf %208, %209 : vector<16x128xf32>
    %211 = arith.truncf %175 : vector<16x32xf32> to vector<16x32xbf16>
    %c0_88 = arith.constant 0 : index
    %c0_89 = arith.constant 0 : index
    %212 = vector.load %arg6[%c0_88, %c0_89] : memref<32x128xbf16, #tpu.memory_space<vmem>>, vector<32x128xbf16>
    %cst_90 = arith.constant dense<0.000000e+00> : vector<16x128xf32>
    %213 = tpu.matmul %211, %212, %cst_90 {dimension_numbers = #tpu.dot_dimension_numbers<[1], [0], [0], [1], [0, 0, 1, 1], [], []>} : vector<16x32xbf16>, vector<32x128xbf16>, vector<16x128xf32> -> vector<16x128xf32>
    %214 = arith.addf %210, %213 : vector<16x128xf32>
    %215 = arith.index_cast %c2_i32 : i32 to index
    %c0_91 = arith.constant 0 : index
    %c0_92 = arith.constant 0 : index
    %216 = vector.load %arg13[%215, %c0_91, %c0_92] : memref<4x16x128xbf16, #tpu.memory_space<vmem>>, vector<1x16x128xbf16>
    %217 = vector.shape_cast %216 : vector<1x16x128xbf16> to vector<16x128xbf16>
    %218 = arith.extf %217 : vector<16x128xbf16> to vector<16x128xf32>
    %219 = vector.broadcast %50 : vector<1x128xf32> to vector<16x128xf32>
    %220 = arith.addf %218, %219 : vector<16x128xf32>
    %221 = arith.truncf %193 : vector<16x32xf32> to vector<16x32xbf16>
    %c0_93 = arith.constant 0 : index
    %c0_94 = arith.constant 0 : index
    %222 = vector.load %arg9[%c0_93, %c0_94] : memref<32x128xbf16, #tpu.memory_space<vmem>>, vector<32x128xbf16>
    %cst_95 = arith.constant dense<0.000000e+00> : vector<16x128xf32>
    %223 = tpu.matmul %221, %222, %cst_95 {dimension_numbers = #tpu.dot_dimension_numbers<[1], [0], [0], [1], [0, 0, 1, 1], [], []>} : vector<16x32xbf16>, vector<32x128xbf16>, vector<16x128xf32> -> vector<16x128xf32>
    %224 = arith.addf %220, %223 : vector<16x128xf32>
    %cst_96 = arith.constant 5.000000e-01 : f32
    %225 = vector.broadcast %cst_96 : f32 to vector<16x128xf32>
    %226 = arith.mulf %225, %214 : vector<16x128xf32>
    %227 = arith.select %58, %214, %226 : vector<16x128xi1>, vector<16x128xf32>
    %228 = math.tanh %227 : vector<16x128xf32>
    %cst_97 = arith.constant 5.000000e-01 : f32
    %229 = vector.broadcast %cst_97 : f32 to vector<16x128xf32>
    %230 = arith.mulf %229, %228 : vector<16x128xf32>
    %cst_98 = arith.constant 5.000000e-01 : f32
    %231 = vector.broadcast %cst_98 : f32 to vector<16x128xf32>
    %232 = arith.addf %231, %230 : vector<16x128xf32>
    %233 = arith.select %58, %228, %232 : vector<16x128xi1>, vector<16x128xf32>
    %234 = vector.extract_strided_slice %233 {offsets = [0, 0], sizes = [16, 32], strides = [1, 1]} : vector<16x128xf32> to vector<16x32xf32>
    %235 = vector.extract_strided_slice %233 {offsets = [0, 32], sizes = [16, 32], strides = [1, 1]} : vector<16x128xf32> to vector<16x32xf32>
    %236 = vector.extract_strided_slice %233 {offsets = [0, 64], sizes = [16, 32], strides = [1, 1]} : vector<16x128xf32> to vector<16x32xf32>
    %237 = vector.extract_strided_slice %233 {offsets = [0, 96], sizes = [16, 32], strides = [1, 1]} : vector<16x128xf32> to vector<16x32xf32>
    %238 = arith.mulf %235, %173 : vector<16x32xf32>
    %239 = arith.mulf %234, %236 : vector<16x32xf32>
    %240 = arith.addf %238, %239 : vector<16x32xf32>
    %241 = math.tanh %240 : vector<16x32xf32>
    %242 = arith.mulf %237, %241 : vector<16x32xf32>
    %cst_99 = arith.constant 5.000000e-01 : f32
    %243 = vector.broadcast %cst_99 : f32 to vector<16x128xf32>
    %244 = arith.mulf %243, %224 : vector<16x128xf32>
    %245 = arith.select %58, %224, %244 : vector<16x128xi1>, vector<16x128xf32>
    %246 = math.tanh %245 : vector<16x128xf32>
    %cst_100 = arith.constant 5.000000e-01 : f32
    %247 = vector.broadcast %cst_100 : f32 to vector<16x128xf32>
    %248 = arith.mulf %247, %246 : vector<16x128xf32>
    %cst_101 = arith.constant 5.000000e-01 : f32
    %249 = vector.broadcast %cst_101 : f32 to vector<16x128xf32>
    %250 = arith.addf %249, %248 : vector<16x128xf32>
    %251 = arith.select %58, %246, %250 : vector<16x128xi1>, vector<16x128xf32>
    %252 = vector.extract_strided_slice %251 {offsets = [0, 0], sizes = [16, 32], strides = [1, 1]} : vector<16x128xf32> to vector<16x32xf32>
    %253 = vector.extract_strided_slice %251 {offsets = [0, 32], sizes = [16, 32], strides = [1, 1]} : vector<16x128xf32> to vector<16x32xf32>
    %254 = vector.extract_strided_slice %251 {offsets = [0, 64], sizes = [16, 32], strides = [1, 1]} : vector<16x128xf32> to vector<16x32xf32>
    %255 = vector.extract_strided_slice %251 {offsets = [0, 96], sizes = [16, 32], strides = [1, 1]} : vector<16x128xf32> to vector<16x32xf32>
    %256 = arith.mulf %253, %191 : vector<16x32xf32>
    %257 = arith.mulf %252, %254 : vector<16x32xf32>
    %258 = arith.addf %256, %257 : vector<16x32xf32>
    %259 = math.tanh %258 : vector<16x32xf32>
    %260 = arith.mulf %255, %259 : vector<16x32xf32>
    %261 = vector.broadcast %204 : vector<16x1xf32> to vector<16x32xf32>
    %262 = arith.mulf %261, %242 : vector<16x32xf32>
    %263 = arith.addf %196, %262 : vector<16x32xf32>
    %264 = vector.broadcast %204 : vector<16x1xf32> to vector<16x32xf32>
    %265 = arith.mulf %264, %260 : vector<16x32xf32>
    %266 = arith.addf %199, %265 : vector<16x32xf32>
    %c3_i32 = arith.constant 3 : i32
    %267 = arith.addi %59, %c3_i32 : i32
    %268 = vector.broadcast %267 : i32 to vector<16x1xi32>
    %269 = arith.cmpi slt, %268, %51 : vector<16x1xi32>
    %cst_102 = arith.constant 0.000000e+00 : f32
    %270 = vector.broadcast %cst_102 : f32 to vector<16x1xf32>
    %271 = arith.select %269, %52, %270 : vector<16x1xi1>, vector<16x1xf32>
    %272 = arith.index_cast %c3_i32 : i32 to index
    %c0_103 = arith.constant 0 : index
    %c0_104 = arith.constant 0 : index
    %273 = vector.load %arg12[%272, %c0_103, %c0_104] : memref<4x16x128xbf16, #tpu.memory_space<vmem>>, vector<1x16x128xbf16>
    %274 = vector.shape_cast %273 : vector<1x16x128xbf16> to vector<16x128xbf16>
    %275 = arith.extf %274 : vector<16x128xbf16> to vector<16x128xf32>
    %276 = vector.broadcast %49 : vector<1x128xf32> to vector<16x128xf32>
    %277 = arith.addf %275, %276 : vector<16x128xf32>
    %278 = arith.truncf %242 : vector<16x32xf32> to vector<16x32xbf16>
    %c0_105 = arith.constant 0 : index
    %c0_106 = arith.constant 0 : index
    %279 = vector.load %arg6[%c0_105, %c0_106] : memref<32x128xbf16, #tpu.memory_space<vmem>>, vector<32x128xbf16>
    %cst_107 = arith.constant dense<0.000000e+00> : vector<16x128xf32>
    %280 = tpu.matmul %278, %279, %cst_107 {dimension_numbers = #tpu.dot_dimension_numbers<[1], [0], [0], [1], [0, 0, 1, 1], [], []>} : vector<16x32xbf16>, vector<32x128xbf16>, vector<16x128xf32> -> vector<16x128xf32>
    %281 = arith.addf %277, %280 : vector<16x128xf32>
    %282 = arith.index_cast %c3_i32 : i32 to index
    %c0_108 = arith.constant 0 : index
    %c0_109 = arith.constant 0 : index
    %283 = vector.load %arg13[%282, %c0_108, %c0_109] : memref<4x16x128xbf16, #tpu.memory_space<vmem>>, vector<1x16x128xbf16>
    %284 = vector.shape_cast %283 : vector<1x16x128xbf16> to vector<16x128xbf16>
    %285 = arith.extf %284 : vector<16x128xbf16> to vector<16x128xf32>
    %286 = vector.broadcast %50 : vector<1x128xf32> to vector<16x128xf32>
    %287 = arith.addf %285, %286 : vector<16x128xf32>
    %288 = arith.truncf %260 : vector<16x32xf32> to vector<16x32xbf16>
    %c0_110 = arith.constant 0 : index
    %c0_111 = arith.constant 0 : index
    %289 = vector.load %arg9[%c0_110, %c0_111] : memref<32x128xbf16, #tpu.memory_space<vmem>>, vector<32x128xbf16>
    %cst_112 = arith.constant dense<0.000000e+00> : vector<16x128xf32>
    %290 = tpu.matmul %288, %289, %cst_112 {dimension_numbers = #tpu.dot_dimension_numbers<[1], [0], [0], [1], [0, 0, 1, 1], [], []>} : vector<16x32xbf16>, vector<32x128xbf16>, vector<16x128xf32> -> vector<16x128xf32>
    %291 = arith.addf %287, %290 : vector<16x128xf32>
    %cst_113 = arith.constant 5.000000e-01 : f32
    %292 = vector.broadcast %cst_113 : f32 to vector<16x128xf32>
    %293 = arith.mulf %292, %281 : vector<16x128xf32>
    %294 = arith.select %58, %281, %293 : vector<16x128xi1>, vector<16x128xf32>
    %295 = math.tanh %294 : vector<16x128xf32>
    %cst_114 = arith.constant 5.000000e-01 : f32
    %296 = vector.broadcast %cst_114 : f32 to vector<16x128xf32>
    %297 = arith.mulf %296, %295 : vector<16x128xf32>
    %cst_115 = arith.constant 5.000000e-01 : f32
    %298 = vector.broadcast %cst_115 : f32 to vector<16x128xf32>
    %299 = arith.addf %298, %297 : vector<16x128xf32>
    %300 = arith.select %58, %295, %299 : vector<16x128xi1>, vector<16x128xf32>
    %301 = vector.extract_strided_slice %300 {offsets = [0, 0], sizes = [16, 32], strides = [1, 1]} : vector<16x128xf32> to vector<16x32xf32>
    %302 = vector.extract_strided_slice %300 {offsets = [0, 32], sizes = [16, 32], strides = [1, 1]} : vector<16x128xf32> to vector<16x32xf32>
    %303 = vector.extract_strided_slice %300 {offsets = [0, 64], sizes = [16, 32], strides = [1, 1]} : vector<16x128xf32> to vector<16x32xf32>
    %304 = vector.extract_strided_slice %300 {offsets = [0, 96], sizes = [16, 32], strides = [1, 1]} : vector<16x128xf32> to vector<16x32xf32>
    %305 = arith.mulf %302, %240 : vector<16x32xf32>
    %306 = arith.mulf %301, %303 : vector<16x32xf32>
    %307 = arith.addf %305, %306 : vector<16x32xf32>
    %308 = math.tanh %307 : vector<16x32xf32>
    %309 = arith.mulf %304, %308 : vector<16x32xf32>
    %cst_116 = arith.constant 5.000000e-01 : f32
    %310 = vector.broadcast %cst_116 : f32 to vector<16x128xf32>
    %311 = arith.mulf %310, %291 : vector<16x128xf32>
    %312 = arith.select %58, %291, %311 : vector<16x128xi1>, vector<16x128xf32>
    %313 = math.tanh %312 : vector<16x128xf32>
    %cst_117 = arith.constant 5.000000e-01 : f32
    %314 = vector.broadcast %cst_117 : f32 to vector<16x128xf32>
    %315 = arith.mulf %314, %313 : vector<16x128xf32>
    %cst_118 = arith.constant 5.000000e-01 : f32
    %316 = vector.broadcast %cst_118 : f32 to vector<16x128xf32>
    %317 = arith.addf %316, %315 : vector<16x128xf32>
    %318 = arith.select %58, %313, %317 : vector<16x128xi1>, vector<16x128xf32>
    %319 = vector.extract_strided_slice %318 {offsets = [0, 0], sizes = [16, 32], strides = [1, 1]} : vector<16x128xf32> to vector<16x32xf32>
    %320 = vector.extract_strided_slice %318 {offsets = [0, 32], sizes = [16, 32], strides = [1, 1]} : vector<16x128xf32> to vector<16x32xf32>
    %321 = vector.extract_strided_slice %318 {offsets = [0, 64], sizes = [16, 32], strides = [1, 1]} : vector<16x128xf32> to vector<16x32xf32>
    %322 = vector.extract_strided_slice %318 {offsets = [0, 96], sizes = [16, 32], strides = [1, 1]} : vector<16x128xf32> to vector<16x32xf32>
    %323 = arith.mulf %320, %258 : vector<16x32xf32>
    %324 = arith.mulf %319, %321 : vector<16x32xf32>
    %325 = arith.addf %323, %324 : vector<16x32xf32>
    %326 = math.tanh %325 : vector<16x32xf32>
    %327 = arith.mulf %322, %326 : vector<16x32xf32>
    %328 = vector.broadcast %271 : vector<16x1xf32> to vector<16x32xf32>
    %329 = arith.mulf %328, %309 : vector<16x32xf32>
    %330 = arith.addf %263, %329 : vector<16x32xf32>
    %331 = vector.broadcast %271 : vector<16x1xf32> to vector<16x32xf32>
    %332 = arith.mulf %331, %327 : vector<16x32xf32>
    %333 = arith.addf %266, %332 : vector<16x32xf32>
    %c4_i32_119 = arith.constant 4 : i32
    %c0_120 = arith.constant 0 : index
    %c0_121 = arith.constant 0 : index
    %334 = vector.load %arg14[%c0_120, %c0_121] : memref<16x32xf32, #tpu.memory_space<vmem>>, vector<16x32xf32>
    tpu.vector_store %arg14[%c0_120, %c0_121], %309 {strides = array<i32>} : memref<16x32xf32, #tpu.memory_space<vmem>>, vector<16x32xf32>,
    %c0_122 = arith.constant 0 : index
    %c0_123 = arith.constant 0 : index
    %335 = vector.load %arg15[%c0_122, %c0_123] : memref<16x32xf32, #tpu.memory_space<vmem>>, vector<16x32xf32>
    tpu.vector_store %arg15[%c0_122, %c0_123], %307 {strides = array<i32>} : memref<16x32xf32, #tpu.memory_space<vmem>>, vector<16x32xf32>,
    %c0_124 = arith.constant 0 : index
    %c0_125 = arith.constant 0 : index
    %336 = vector.load %arg16[%c0_124, %c0_125] : memref<16x32xf32, #tpu.memory_space<vmem>>, vector<16x32xf32>
    tpu.vector_store %arg16[%c0_124, %c0_125], %330 {strides = array<i32>} : memref<16x32xf32, #tpu.memory_space<vmem>>, vector<16x32xf32>,
    %c0_126 = arith.constant 0 : index
    %c0_127 = arith.constant 0 : index
    %337 = vector.load %arg17[%c0_126, %c0_127] : memref<16x32xf32, #tpu.memory_space<vmem>>, vector<16x32xf32>
    tpu.vector_store %arg17[%c0_126, %c0_127], %327 {strides = array<i32>} : memref<16x32xf32, #tpu.memory_space<vmem>>, vector<16x32xf32>,
    %c0_128 = arith.constant 0 : index
    %c0_129 = arith.constant 0 : index
    %338 = vector.load %arg18[%c0_128, %c0_129] : memref<16x32xf32, #tpu.memory_space<vmem>>, vector<16x32xf32>
    tpu.vector_store %arg18[%c0_128, %c0_129], %325 {strides = array<i32>} : memref<16x32xf32, #tpu.memory_space<vmem>>, vector<16x32xf32>,
    %c0_130 = arith.constant 0 : index
    %c0_131 = arith.constant 0 : index
    %339 = vector.load %arg19[%c0_130, %c0_131] : memref<16x32xf32, #tpu.memory_space<vmem>>, vector<16x32xf32>
    tpu.vector_store %arg19[%c0_130, %c0_131], %333 {strides = array<i32>} : memref<16x32xf32, #tpu.memory_space<vmem>>, vector<16x32xf32>,
    %c1_i32_132 = arith.constant 1 : i32
    %340 = arith.cmpi eq, %arg0, %c1_i32_132 : i32
    %341 = arith.extui %340 : i1 to i32
    %c0_i32_133 = arith.constant 0 : i32
    %342 = arith.cmpi ne, %341, %c0_i32_133 : i32
    scf.if %342 {
      %c0_134 = arith.constant 0 : index
      %c0_135 = arith.constant 0 : index
      %343 = vector.load %arg11[%c0_134, %c0_135] : memref<16x64xf32, #tpu.memory_space<vmem>>, vector<16x32xf32>
      tpu.vector_store %arg11[%c0_134, %c0_135], %330 {strides = array<i32>} : memref<16x64xf32, #tpu.memory_space<vmem>>, vector<16x32xf32>,
      %c0_136 = arith.constant 0 : index
      %c32 = arith.constant 32 : index
      %344 = vector.load %arg11[%c0_136, %c32] : memref<16x64xf32, #tpu.memory_space<vmem>>, vector<16x32xf32>
      tpu.vector_store %arg11[%c0_136, %c32], %333 {strides = array<i32>} : memref<16x64xf32, #tpu.memory_space<vmem>>, vector<16x32xf32>,
    } else {
    }
    return
  }
  func.func @transform_0(%arg0: i32) -> (i32, i32) {
    %c0_i32 = arith.constant 0 : i32
    %c0_i32_0 = arith.constant 0 : i32
    %c0_i32_1 = arith.constant 0 : i32
    return %c0_i32, %c0_i32_0 : i32, i32
  }
  func.func @transform_1(%arg0: i32) -> (i32, i32) {
    %c0_i32 = arith.constant 0 : i32
    %c0_i32_0 = arith.constant 0 : i32
    %c0_i32_1 = arith.constant 0 : i32
    return %c0_i32, %c0_i32_0 : i32, i32
  }
  func.func @transform_2(%arg0: i32) -> (i32, i32) {
    %c0_i32 = arith.constant 0 : i32
    %c0_i32_0 = arith.constant 0 : i32
    return %arg0, %c0_i32 : i32, i32
  }
  func.func @transform_3(%arg0: i32) -> (i32, i32) {
    %c0_i32 = arith.constant 0 : i32
    %c0_i32_0 = arith.constant 0 : i32
    return %arg0, %c0_i32 : i32, i32
  }
  func.func @transform_4(%arg0: i32) -> (i32, i32) {
    %c0_i32 = arith.constant 0 : i32
    %c0_i32_0 = arith.constant 0 : i32
    %c0_i32_1 = arith.constant 0 : i32
    return %c0_i32, %c0_i32_0 : i32, i32
  }
  func.func @transform_5(%arg0: i32) -> (i32, i32) {
    %c0_i32 = arith.constant 0 : i32
    %c0_i32_0 = arith.constant 0 : i32
    %c0_i32_1 = arith.constant 0 : i32
    return %c0_i32, %c0_i32_0 : i32, i32
  }
  func.func @transform_6(%arg0: i32) -> (i32, i32) {
    %c0_i32 = arith.constant 0 : i32
    %c0_i32_0 = arith.constant 0 : i32
    %c0_i32_1 = arith.constant 0 : i32
    return %c0_i32, %c0_i32_0 : i32, i32
  }
  func.func @transform_7(%arg0: i32) -> (i32, i32) {
    %c0_i32 = arith.constant 0 : i32
    %c0_i32_0 = arith.constant 0 : i32
    %c0_i32_1 = arith.constant 0 : i32
    return %c0_i32, %c0_i32_0 : i32, i32
  }
  func.func @transform_8(%arg0: i32) -> (i32, i32) {
    %c0_i32 = arith.constant 0 : i32
    %c0_i32_0 = arith.constant 0 : i32
    %c0_i32_1 = arith.constant 0 : i32
    return %c0_i32, %c0_i32_0 : i32, i32
  }
  func.func @transform_9(%arg0: i32) -> (i32, i32) {
    %c0_i32 = arith.constant 0 : i32
    %c0_i32_0 = arith.constant 0 : i32
    %c0_i32_1 = arith.constant 0 : i32
    return %c0_i32, %c0_i32_0 : i32, i32
  }
  func.func @transform_10(%arg0: i32) -> (i32, i32) {
    %c0_i32 = arith.constant 0 : i32
    %c0_i32_0 = arith.constant 0 : i32
    %c0_i32_1 = arith.constant 0 : i32
    return %c0_i32, %c0_i32_0 : i32, i32
  }
}

</mosaic_0001>

<bundles_post_ra>
// kernel: decoder_forward.1
= control target key start
LH: loop header
LB: loop body
LE: loop exit
PB: predicated region body
PF: predicated region fallthrough
CT: control target
= control target key end

     0   :  { %s1861_s13 = smov 0   ;;  %s2350_s0 = inlined_call_operand.vmem [shape: s32[16,1], index: 0, kind: input, shape index: {}]   ;;  %s2351_s1 = inlined_call_operand.vmem [shape: f32[16,1], index: 1, kind: input, shape index: {}]   ;;  %s2352_s2 = inlined_call_operand.vmem [shape: bf16[128,32], index: 2, kind: input, shape index: {}]   ;;  %s2353_s3 = inlined_call_operand.vmem [shape: bf16[128,32], index: 3, kind: input, shape index: {}]   ;;  %s2354_s4 = inlined_call_operand.vmem [shape: bf16[32,128], index: 4, kind: input, shape index: {}]   ;;  %s2355_s5 = inlined_call_operand.vmem [shape: bf16[32,128], index: 5, kind: input, shape index: {}]   ;;  %s2356_s6 = inlined_call_operand.vmem [shape: f32[1,128], index: 6, kind: input, shape index: {}]   ;;  %s2357_s7 = inlined_call_operand.vmem [shape: bf16[32,128], index: 7, kind: input, shape index: {}]   ;;  %s2358_s8 = inlined_call_operand.vmem [shape: bf16[32,128], index: 8, kind: input, shape index: {}]   ;;  %s2359_s9 = inlined_call_operand.vmem [shape: f32[1,128], index: 9, kind: input, shape index: {}]   ;;  %s2360_s10 = inlined_call_operand.vmem [shape: f32[16,64], index: 10, kind: output, shape index: {}]  }
   0x1 LB: > { %s1867_s14 = sadd.s32 4294967295, %s1798_s13   ;;  %p1531_p0 = scmp.ge.s32.totalorder %s1798_s13, 1  ;;  %s1798_s13 = sphi %s1861_s13, %s20_s13  }
   0x2   : > { %p319_p1 = scmp.lt.s32.totalorder %s1798_s13, 3 }
   0x4   : > { %p320_p2 = pnand %p1531_p0, %p319_p1 }
   0x5   : > { %s1532_s15 = sshll.u32 (!%p320_p2), %s1867_s14, 3  ;;  %p1536_p4 = scmp.ne.s32.totalorder (!%p320_p2), %s1867_s14, 0 }
   0x6   : > { %323 = sbr.rel (%p320_p2) target bundleno = 2684 (0xa7c), region = 60  ;;  %p358_p3 = scmp.lt.s32.totalorder (!%p320_p2), %s1532_s15, 15 }
   0xb   : > { %s2364_s15 = smov (!%p358_p3, %s1532_s15), 15  ;;  %373 = sbr.rel (%p1536_p4) target bundleno = 29 (0x1d), region = 64 }
   0xc   : > { %s1533_s16 = sshll.u32 %s2364_s15, 2 }
   0xd   : > { %s1875_s19 = scalar_lea.vmem %s2352_s2, %s1533_s16  ;;  %s1880_s22 = scalar_lea.vmem %s2353_s3, %s1533_s16 }
  0x10   : > { %vm374_vm0 = vcmask 261120   ;;  %v1800_v0 = vmov 0.0  }
  0x11   : > { %375 = vst.msk [vmem:[#allocation4] sm:$0xff] %vm374_vm0, %v1800_v0 }
  0x12   : > { %376 = vst.msk [vmem:[#allocation4 + $0x8] sm:$0xff] %vm374_vm0, %v1800_v0 }
  0x13   : > { %377 = vst.msk [vmem:[#allocation5] sm:$0xff] %vm374_vm0, %v1800_v0 }
  0x14   : > { %378 = vst.msk [vmem:[#allocation5 + $0x8] sm:$0xff] %vm374_vm0, %v1800_v0 }
  0x15   : > { %379 = vst.msk [vmem:[#allocation6] sm:$0xff] %vm374_vm0, %v1800_v0 }
  0x16   : > { %380 = vst.msk [vmem:[#allocation6 + $0x8] sm:$0xff] %vm374_vm0, %v1800_v0 }
  0x17   : > { %381 = vst.msk [vmem:[#allocation7] sm:$0xff] %vm374_vm0, %v1800_v0 }
  0x18   : > { %382 = vst.msk [vmem:[#allocation7 + $0x8] sm:$0xff] %vm374_vm0, %v1800_v0 }
  0x19   : > { %383 = vst.msk [vmem:[#allocation8] sm:$0xff] %vm374_vm0, %v1800_v0 }
  0x1a   : > { %384 = vst.msk [vmem:[#allocation8 + $0x8] sm:$0xff] %vm374_vm0, %v1800_v0 }
  0x1b   : > { %385 = vst.msk [vmem:[#allocation9] sm:$0xff] %vm374_vm0, %v1800_v0 }
  0x1c   : > { %386 = vst.msk [vmem:[#allocation9 + $0x8] sm:$0xff] %vm374_vm0, %v1800_v0 }
  0x1d PF: > { %v1626_v1 = vld [vmem:[%s2354_s4 + $0x8] sm:$0xff]  ;;  %v1625_v4 = vld [vmem:[%s2354_s4] sm:$0xff]  ;;  %v608_v7 = vld [vmem:[#allocation4] sm:$0xff]  ;;  %s1801_s20 = smov 32   ;;  %vm431_vm1 = vcmask 261120   ;;  %v602_v21 = vlaneseq  ;;  %s1802_s28 = smov 64  }
  0x1e   : > { %v1632_v2 = vld [vmem:[%s2357_s7 + $0x8] sm:$0xff]  ;;  %450 = vmatpush.bf16.msra.mxu0 %v1626_v1  ;;  %v1631_v5 = vld [vmem:[%s2357_s7] sm:$0xff]  ;;  %v609_v8 = vld [vmem:[#allocation4 + $0x8] sm:$0xff]  ;;  %s1804_s24 = smov 96   ;;  %p1618_p5 = scmp.ne.s32.totalorder %s1867_s14, 1 }
  0x1f   : > { %v1892_v3 = vld [vmem:[%s2355_s5 + $0x8] sm:$0xff]  ;;  %535 = vmatpush.bf16.msra.mxu1 %v1632_v2  ;;  %v1903_v6 = vld [vmem:[%s2355_s5] sm:$0xff]  ;;  %v634_v13 = vpack.c.bf16 %v609_v8, %v608_v7  ;;  %v603_v24 = vand.u32 127, %v602_v21  ;;  %s1805_s26 = smov (!%p1618_p5), 32  }
  0x20   : > { %660 = vmatpush.bf16.msra.mxu2 %v1892_v3  ;;  %v1909_v9 = vld [vmem:[%s2358_s8 + $0x8] sm:$0xff]  ;;  %v1621_v10 = vld [vmem:[%s1875_s19] sm:$0xff]  ;;  %v616_v8 = vld [vmem:[#allocation8] sm:$0xff] }
  0x21   : > { %v610_v11 = vld [vmem:[#allocation5] sm:$0xff]  ;;  %705 = vmatpush.bf16.msra.mxu3 %v1909_v9  ;;  %v615_v16 = vld [vmem:[#allocation7 + $0x8] sm:$0xff]  ;;  %vm604_vm2 = vcmp.ge.s32.totalorder %v603_v24, 64  ;;  %vm605_vm3 = vcmp.lt.s32.totalorder %v603_v24, 96 }
  0x22   : > { %v1627_v12 = vld [vmem:[%s1880_s22] sm:$0xff]  ;;  %729 = vrot.lane.b32.xlu2 %v610_v11, %s1801_s20  ;;  %451 = vmatpush.bf16.msra.mxu0 %v1625_v4  ;;  %v611_v18 = vld [vmem:[#allocation5 + $0x8] sm:$0xff]  ;;  %vm1949_vm4 = vmand %vm604_vm2, %vm605_vm3 }
  0x23   : > { %536 = vmatpush.bf16.msra.mxu1 %v1631_v5  ;;  %v1918_v14 = vld [vmem:[%s2358_s8] sm:$0xff] }
  0x24   : > { %v614_v15 = vld [vmem:[#allocation7] sm:$0xff]  ;;  %661 = vmatpush.bf16.msra.mxu2 %v1903_v6 }
  0x25   : > { %1561 = vmatmul.msk.bf16.vlgmr.msra.gmra.mxu0 %vm431_vm1, %v1621_v10  ;;  %v679_v17 = vpack.c.bf16 %v615_v16, %v614_v15  ;;  %706 = vmatpush.bf16.msra.mxu3 %v1918_v14  ;;  %v1938_v27 = vld [vmem:[%s2356_s6] ss:$0 sm:$0xff]  ;;  %v617_v10 = vld [vmem:[#allocation8 + $0x8] sm:$0xff] }
  0x26   : > { %1589 = vmatmul.msk.bf16.vlgmr.msra.gmra.mxu1 %vm431_vm1, %v1627_v12  ;;  %v1943_v29 = vld [vmem:[%s2359_s9] ss:$0 sm:$0xff] }
  0x27   : > { %1602 = vmatmul.msk.bf16.vlgmr.msra.gmra.mxu2 %vm431_vm1, %v634_v13 }
  0x28   : > { %882 = vmatpush.bf16.msrb.mxu2 %v1892_v3  ;;  %1611 = vmatmul.msk.bf16.vlgmr.msra.gmra.mxu3 %vm431_vm1, %v679_v17 }
  0x29   : > { %911 = vmatpush.bf16.msrb.mxu3 %v1909_v9 }
  0x2a   : > { %731 = vrot.lane.b32.xlu2 %v611_v18, %s1801_s20 }
  0x2c   : > { %883 = vmatpush.bf16.msrb.mxu2 %v1903_v6 }
  0x2d   : > { %912 = vmatpush.bf16.msrb.mxu3 %v1918_v14 }
  0x30   : > { %1072 = vmatpush.bf16.msra.mxu2 %v1892_v3 }
  0x31   : > { %1101 = vmatpush.bf16.msra.mxu3 %v1909_v9 }
  0x34   : > { %1073 = vmatpush.bf16.msra.mxu2 %v1903_v6 }
  0x35   : > { %1102 = vmatpush.bf16.msra.mxu3 %v1918_v14 }
  0xa2   : > { %v453_v19 = vpop.f32.mrf.mxu0 }
  0xa3   : > { %v538_v20 = vpop.f32.mrf.mxu1 }
  0xaa   : > { %v663_v22 = vpop.f32.mrf.mxu2  ;;  %v455_v23 = vpop.f32.mrf.mxu0 }
  0xab   : > { %v540_v25 = vpop.f32.mrf.mxu1  ;;  %v1640_v26 = vpack.c.bf16 %v455_v23, %v453_v19  ;;  %v708_v30 = vpop.f32.mrf.mxu3 }
  0xac   : > { %v1645_v28 = vpack.c.bf16 %v540_v25, %v538_v20  ;;  %v730_v20 = vpop.permute.xlu2 %729 }
  0xad   : > { %v1679_v31 = vunpack.c.l.bf16 %v1640_v26  ;;  %v1680_v32 = vunpack.c.h.bf16 %v1640_v26 }
  0xae   : > { %v1683_v33 = vunpack.c.l.bf16 %v1645_v28  ;;  %v1684_v34 = vunpack.c.h.bf16 %v1645_v28 }
  0xaf   : > { %v632_v35 = vadd.f32 %v1938_v27, %v1679_v31  ;;  %v633_v36 = vadd.f32 %v1938_v27, %v1680_v32 }
  0xb0   : > { %v677_v37 = vadd.f32 %v1943_v29, %v1683_v33  ;;  %v678_v41 = vadd.f32 %v1943_v29, %v1684_v34 }
  0xb1   : > { %v668_v38 = vadd.f32 %v663_v22, %v632_v35 }
  0xb2   : > { %v665_v39 = vpop.f32.mrf.mxu2  ;;  %v713_v40 = vadd.f32 %v708_v30, %v677_v37 }
  0xb3   : > { %v669_v43 = vadd.f32 %v665_v39, %v633_v36  ;;  %v715_v44 = vmul.f32 0.5, %v668_v38  ;;  %v710_v47 = vpop.f32.mrf.mxu3 }
  0xb4   : > { %v769_v45 = vmul.f32 0.5, %v713_v40  ;;  %v714_v50 = vadd.f32 %v710_v47, %v678_v41  ;;  %v732_v21 = vpop.permute.xlu2 %731 }
  0xb5   : > { %v716_v46 = vmul.f32 0.5, %v669_v43  ;;  %v717_v48 = vsel %vm1949_vm4, %v668_v38, %v715_v44  ;;  %v1628_v44 = vld [vmem:[%s1880_s22 + $0x8] sm:$0xff] }
  0xb6   : > { %v771_v49 = vsel %vm1949_vm4, %v713_v40, %v769_v45  ;;  %1728 = vtanh.f32 %v717_v48  ;;  %v770_v52 = vmul.f32 0.5, %v714_v50  ;;  %1590 = vmatmul.msk.bf16.gmra.mxu1 %vm431_vm1, %v1628_v44 }
  0xb7   : > { %v718_v51 = vsel %vm1949_vm4, %v669_v43, %v716_v46 }
  0xb8   : > { %1730 = vtanh.f32 %v718_v51  ;;  %v772_v53 = vsel %vm1949_vm4, %v714_v50, %v770_v52 }
  0xb9   : > { %1732 = vtanh.f32 %v771_v49 }
  0xba   : > { %1734 = vtanh.f32 %v772_v53 }
  0xbc   : > { %v1729_v54 = vpop.eup %1728 }
  0xbd   : > { %v721_v56 = vmul.f32 0.5, %v1729_v54 }
  0xbe   : > { %v1731_v55 = vpop.eup %1730 }
  0xbf   : > { %v1733_v57 = vpop.eup %1732  ;;  %v723_v58 = vadd.f32 0.5, %v721_v56  ;;  %v722_v62 = vmul.f32 0.5, %v1731_v55 }
  0xc0   : > { %v775_v59 = vmul.f32 0.5, %v1733_v57  ;;  %v1735_v60 = vpop.eup %1734 }
  0xc1   : > { %v1963_v61 = vsel %vm1949_vm4, %v1729_v54, %v723_v58  ;;  %v776_v0 = vmul.f32 0.5, %v1735_v60  ;;  %v724_v2 = vadd.f32 0.5, %v722_v62  ;;  %v1622_v54 = vld [vmem:[%s1875_s19 + $0x8] sm:$0xff] }
  0xc2   : > { %v777_v63 = vadd.f32 0.5, %v775_v59  ;;  %739 = vrot.lane.b32.xlu0 %v1963_v61, %s1802_s28  ;;  %v735_v22 = vmul.f32 %v730_v20, %v1963_v61  ;;  %1562 = vmatmul.msk.bf16.gmra.mxu0 %vm431_vm1, %v1622_v54 }
  0xc3   : > { %v778_v4 = vadd.f32 0.5, %v776_v0  ;;  %v726_v5 = vsel %vm1949_vm4, %v1731_v55, %v724_v2 }
  0xc4   : > { %v779_v1 = vsel %vm1949_vm4, %v1733_v57, %v777_v63  ;;  %v736_v37 = vmul.f32 %v732_v21, %v726_v5 }
  0xc5   : > { %793 = vrot.lane.b32.xlu1 %v779_v1, %s1802_s28  ;;  %v780_v7 = vsel %vm1949_vm4, %v1735_v60, %v778_v4 }
  0xca   : > { %741 = vrot.lane.b32.xlu0 %v726_v5, %s1802_s28 }
  0xcd   : > { %795 = vrot.lane.b32.xlu1 %v780_v7, %s1802_s28 }
  0xd2   : > { %783 = vrot.lane.b32.xlu0 %v616_v8, %s1801_s20 }
  0xd5   : > { %785 = vrot.lane.b32.xlu1 %v617_v10, %s1801_s20 }
 0x133   : > { %v543_v57 = vpop.f32.mrf.mxu1 }
 0x134   : > { %v740_v11 = vpop.permute.xlu0 %739 }
 0x135   : > { %v745_v12 = vmul.f32 %v740_v11, %v1963_v61 }
 0x137   : > { %v794_v13 = vpop.permute.xlu1 %793  ;;  %749 = vrot.lane.b32.xlu2 %v745_v12, %s1801_s20 }
 0x138   : > { %v799_v15 = vmul.f32 %v794_v13, %v779_v1 }
 0x13a   : > { %803 = vrot.lane.b32.xlu1 %v799_v15, %s1801_s20 }
 0x13b   : > { %v545_v58 = vpop.f32.mrf.mxu1 }
 0x13c   : > { %v742_v16 = vpop.permute.xlu0 %741  ;;  %v1655_v59 = vpack.c.bf16 %v545_v58, %v543_v57 }
 0x13d   : > { %v746_v17 = vmul.f32 %v742_v16, %v726_v5 }
 0x13e   : > { %v1691_v60 = vunpack.c.l.bf16 %v1655_v59 }
 0x13f   : > { %v796_v18 = vpop.permute.xlu1 %795  ;;  %751 = vrot.lane.b32.xlu0 %v746_v17, %s1801_s20 }
 0x140   : > { %v800_v19 = vmul.f32 %v796_v18, %v780_v7 }
 0x142   : > { %805 = vrot.lane.b32.xlu2 %v800_v19, %s1801_s20 }
 0x144   : > { %v784_v33 = vpop.permute.xlu0 %783 }
 0x145   : > { %v789_v34 = vmul.f32 %v784_v33, %v779_v1 }
 0x147   : > { %v786_v25 = vpop.permute.xlu1 %785 }
 0x148   : > { %v790_v28 = vmul.f32 %v786_v25, %v780_v7 }
 0x191   : > { %v750_v23 = vpop.permute.xlu2 %749 }
 0x192   : > { %v1984_v24 = vadd.f32 %v750_v23, %v735_v22 }
 0x194   : > { %1736 = vtanh.f32 %v1984_v24 }
 0x19a   : > { %v1737_v26 = vpop.eup %1736 }
 0x19b   : > { %761 = vrot.lane.b32.xlu0 %v1737_v26, %s1802_s28 }
 0x19c   : > { %v806_v30 = vpop.permute.xlu2 %805 }
 0x19d   : > { %v1988_v31 = vadd.f32 %v806_v30, %v790_v28 }
 0x19f   : > { %1738 = vtanh.f32 %v1988_v31 }
 0x1a5   : > { %v1739_v32 = vpop.eup %1738 }
 0x1a6   : > { %817 = vrot.lane.b32.xlu0 %v1739_v32, %s1802_s28 }
 0x1ac   : > { %v804_v35 = vpop.permute.xlu1 %803 }
 0x1ad   : > { %v1992_v36 = vadd.f32 %v804_v35, %v789_v34 }
 0x1af   : > { %1740 = vtanh.f32 %v1992_v36 }
 0x1b1   : > { %v752_v38 = vpop.permute.xlu0 %751 }
 0x1b2   : > { %v1995_v39 = vadd.f32 %v752_v38, %v736_v37 }
 0x1b4   : > { %1742 = vtanh.f32 %v1995_v39 }
 0x1b5   : > { %v1741_v40 = vpop.eup %1740 }
 0x1b6   : > { %815 = vrot.lane.b32.xlu2 %v1741_v40, %s1802_s28 }
 0x1ba   : > { %v1743_v41 = vpop.eup %1742 }
 0x1bb   : > { %763 = vrot.lane.b32.xlu1 %v1743_v41, %s1802_s28 }
 0x20d   : > { %v762_v43 = vpop.permute.xlu0 %761 }
 0x20e   : > { %v2010_v51 = vmul.f32 %v762_v43, %v1963_v61  ;;  %v896_v61 = vadd.f32 %v1943_v29, %v1691_v60 }
 0x210   : > { %v816_v45 = vpop.permute.xlu2 %815 }
 0x211   : > { %v2002_v47 = vmul.f32 %v816_v45, %v779_v1 }
 0x218   : > { %v818_v46 = vpop.permute.xlu0 %817 }
 0x219   : > { %v2004_v48 = vmul.f32 %v818_v46, %v780_v7 }
 0x21b   : > { %v898_v49 = vpack.c.bf16 %v2004_v48, %v2002_v47 }
 0x21d   : > { %900 = vrot.lane.b32.xlu2 %v898_v49, %s1801_s20 }
 0x22d   : > { %v764_v50 = vpop.permute.xlu1 %763 }
 0x22e   : > { %v2012_v52 = vmul.f32 %v764_v50, %v726_v5  ;;  %v1692_v5 = vunpack.c.h.bf16 %v1655_v59 }
 0x230   : > { %v869_v53 = vpack.c.bf16 %v2012_v52, %v2010_v51  ;;  %v897_v8 = vadd.f32 %v1943_v29, %v1692_v5 }
 0x232   : > { %871 = vrot.lane.b32.xlu1 %v869_v53, %s1801_s20 }
 0x277   : > { %v901_v55 = vpop.permute.xlu2 %900 }
 0x278   : > { %1613 = vmatmul.msk.bf16.vlgmr.msrb.gmra.mxu3 %vm431_vm1, %v901_v55 }
 0x279   : > { %1291 = vmatpush.bf16.msrb.mxu3 %v1909_v9 }
 0x27d   : > { %1292 = vmatpush.bf16.msrb.mxu3 %v1918_v14 }
 0x2a4   : > { %v872_v56 = vpop.permute.xlu1 %871 }
 0x2a5   : > { %1612 = vmatmul.msk.bf16.vlgmr.msrb.gmra.mxu2 %vm431_vm1, %v872_v56 }
 0x2a6   : > { %1262 = vmatpush.bf16.msrb.mxu2 %v1892_v3 }
 0x2aa   : > { %1263 = vmatpush.bf16.msrb.mxu2 %v1903_v6  ;;  %v458_v6 = vpop.f32.mrf.mxu0 }
 0x2b2   : > { %v460_v4 = vpop.f32.mrf.mxu0 }
 0x2b3   : > { %v1650_v7 = vpack.c.bf16 %v460_v4, %v458_v6 }
 0x2b5   : > { %v1687_v11 = vunpack.c.l.bf16 %v1650_v7  ;;  %v1688_v18 = vunpack.c.h.bf16 %v1650_v7  ;;  %v1623_v7 = vld [vmem:[%s1875_s19 + $0x10] sm:$0xff] }
 0x2b6   : > { %1563 = vmatmul.msk.bf16.gmra.mxu0 %vm431_vm1, %v1623_v7 }
 0x2b7   : > { %v867_v13 = vadd.f32 %v1938_v27, %v1687_v11  ;;  %v868_v22 = vadd.f32 %v1938_v27, %v1688_v18 }
 0x2fb   : > { %v914_v62 = vpop.f32.mrf.mxu3 }
 0x2fc   : > { %v919_v63 = vadd.f32 %v914_v62, %v896_v61 }
 0x2fe   : > { %v967_v0 = vmul.f32 0.5, %v919_v63 }
 0x300   : > { %v969_v9 = vsel %vm1949_vm4, %v919_v63, %v967_v0 }
 0x301   : > { %1744 = vtanh.f32 %v969_v9 }
 0x303   : > { %v916_v10 = vpop.f32.mrf.mxu3 }
 0x304   : > { %v920_v12 = vadd.f32 %v916_v10, %v897_v8 }
 0x306   : > { %v968_v16 = vmul.f32 0.5, %v920_v12 }
 0x307   : > { %v1745_v14 = vpop.eup %1744 }
 0x308   : > { %v973_v1 = vmul.f32 0.5, %v1745_v14  ;;  %v970_v20 = vsel %vm1949_vm4, %v920_v12, %v968_v16 }
 0x30a   : > { %v975_v2 = vadd.f32 0.5, %v973_v1 }
 0x30c   : > { %v2030_v3 = vsel %vm1949_vm4, %v1745_v14, %v975_v2 }
 0x30d   : > { %983 = vrot.lane.b32.xlu2 %v2030_v3, %s1802_s28  ;;  %v979_v58 = vmul.f32 %v2030_v3, %v1992_v36 }
 0x328   : > { %v885_v15 = vpop.f32.mrf.mxu2 }
 0x329   : > { %v890_v17 = vadd.f32 %v885_v15, %v867_v13 }
 0x32b   : > { %v921_v19 = vmul.f32 0.5, %v890_v17 }
 0x32d   : > { %v923_v21 = vsel %vm1949_vm4, %v890_v17, %v921_v19 }
 0x32e   : > { %1746 = vtanh.f32 %v923_v21 }
 0x32f   : > { %1748 = vtanh.f32 %v970_v20 }
 0x330   : > { %v887_v23 = vpop.f32.mrf.mxu2 }
 0x331   : > { %v891_v25 = vadd.f32 %v887_v23, %v868_v22 }
 0x333   : > { %v922_v26 = vmul.f32 0.5, %v891_v25  ;;  %v463_v21 = vpop.f32.mrf.mxu0 }
 0x334   : > { %v1747_v28 = vpop.eup %1746 }
 0x335   : > { %v924_v30 = vsel %vm1949_vm4, %v891_v25, %v922_v26  ;;  %v927_v32 = vmul.f32 0.5, %v1747_v28  ;;  %v1749_v33 = vpop.eup %1748 }
 0x336   : > { %1750 = vtanh.f32 %v924_v30  ;;  %v974_v37 = vmul.f32 0.5, %v1749_v33 }
 0x337   : > { %v929_v34 = vadd.f32 0.5, %v927_v32 }
 0x338   : > { %v976_v41 = vadd.f32 0.5, %v974_v37 }
 0x339   : > { %v931_v35 = vsel %vm1949_vm4, %v1747_v28, %v929_v34 }
 0x33a   : > { %937 = vrot.lane.b32.xlu0 %v931_v35, %s1802_s28  ;;  %v978_v45 = vsel %vm1949_vm4, %v1749_v33, %v976_v41  ;;  %v933_v36 = vmul.f32 %v931_v35, %v1984_v24  ;;  %v1629_v24 = vld [vmem:[%s1880_s22 + $0x10] sm:$0xff] }
 0x33b   : > { %v980_v2 = vmul.f32 %v978_v45, %v1988_v31  ;;  %1591 = vmatmul.msk.bf16.gmra.mxu1 %vm431_vm1, %v1629_v24  ;;  %v465_v23 = vpop.f32.mrf.mxu0 }
 0x33c   : > { %v1751_v38 = vpop.eup %1750  ;;  %v1660_v26 = vpack.c.bf16 %v465_v23, %v463_v21 }
 0x33d   : > { %v928_v40 = vmul.f32 0.5, %v1751_v38 }
 0x33e   : > { %v1695_v30 = vunpack.c.l.bf16 %v1660_v26 }
 0x33f   : > { %v930_v43 = vadd.f32 0.5, %v928_v40  ;;  %v1696_v40 = vunpack.c.h.bf16 %v1660_v26 }
 0x340   : > { %v1057_v33 = vadd.f32 %v1938_v27, %v1695_v30 }
 0x341   : > { %v932_v44 = vsel %vm1949_vm4, %v1751_v38, %v930_v43 }
 0x342   : > { %939 = vrot.lane.b32.xlu1 %v932_v44, %s1802_s28  ;;  %985 = vrot.lane.b32.xlu0 %v978_v45, %s1802_s28  ;;  %v934_v62 = vmul.f32 %v932_v44, %v1995_v39 }
 0x367   : > { %v984_v46 = vpop.permute.xlu2 %983 }
 0x368   : > { %v989_v49 = vmul.f32 %v984_v46, %v2030_v3 }
 0x36a   : > { %993 = vrot.lane.b32.xlu0 %v989_v49, %s1801_s20  ;;  %v1058_v49 = vadd.f32 %v1938_v27, %v1696_v40 }
 0x3ac   : > { %v938_v50 = vpop.permute.xlu0 %937 }
 0x3ad   : > { %v943_v53 = vmul.f32 %v938_v50, %v931_v35 }
 0x3af   : > { %947 = vrot.lane.b32.xlu1 %v943_v53, %s1801_s20 }
 0x3b4   : > { %v940_v54 = vpop.permute.xlu1 %939  ;;  %v986_v55 = vpop.permute.xlu0 %985 }
 0x3b5   : > { %v944_v56 = vmul.f32 %v940_v54, %v932_v44  ;;  %v990_v57 = vmul.f32 %v986_v55, %v978_v45 }
 0x3b7   : > { %949 = vrot.lane.b32.xlu2 %v944_v56, %s1801_s20  ;;  %995 = vrot.lane.b32.xlu1 %v990_v57, %s1801_s20 }
 0x3dc   : > { %v994_v59 = vpop.permute.xlu0 %993 }
 0x3dd   : > { %v2059_v60 = vadd.f32 %v994_v59, %v979_v58 }
 0x3df   : > { %1752 = vtanh.f32 %v2059_v60 }
 0x3e5   : > { %v1753_v61 = vpop.eup %1752 }
 0x3e6   : > { %1005 = vrot.lane.b32.xlu1 %v1753_v61, %s1802_s28 }
 0x411   : > { %v950_v63 = vpop.permute.xlu2 %949 }
 0x412   : > { %v2064_v0 = vadd.f32 %v950_v63, %v934_v62 }
 0x414   : > { %1754 = vtanh.f32 %v2064_v0 }
 0x41a   : > { %v1755_v9 = vpop.eup %1754 }
 0x41b   : > { %961 = vrot.lane.b32.xlu0 %v1755_v9, %s1802_s28 }
 0x421   : > { %v948_v14 = vpop.permute.xlu1 %947 }
 0x422   : > { %v2069_v1 = vadd.f32 %v948_v14, %v933_v36 }
 0x424   : > { %1756 = vtanh.f32 %v2069_v1 }
 0x429   : > { %v996_v39 = vpop.permute.xlu1 %995 }
 0x42a   : > { %v1757_v6 = vpop.eup %1756  ;;  %v2073_v4 = vadd.f32 %v996_v39, %v980_v2 }
 0x42b   : > { %959 = vrot.lane.b32.xlu2 %v1757_v6, %s1802_s28 }
 0x42c   : > { %1758 = vtanh.f32 %v2073_v4 }
 0x432   : > { %v1759_v5 = vpop.eup %1758 }
 0x433   : > { %1007 = vrot.lane.b32.xlu2 %v1759_v5, %s1802_s28 }
 0x458   : > { %v1006_v10 = vpop.permute.xlu1 %1005 }
 0x459   : > { %v2083_v12 = vmul.f32 %v1006_v10, %v2030_v3  ;;  %v548_v3 = vpop.f32.mrf.mxu1 }
 0x461   : > { %v550_v22 = vpop.f32.mrf.mxu1 }
 0x462   : > { %v1665_v25 = vpack.c.bf16 %v550_v22, %v548_v3 }
 0x464   : > { %v1699_v28 = vunpack.c.l.bf16 %v1665_v25  ;;  %v1700_v41 = vunpack.c.h.bf16 %v1665_v25 }
 0x466   : > { %v1086_v32 = vadd.f32 %v1943_v29, %v1699_v28  ;;  %v1087_v50 = vadd.f32 %v1943_v29, %v1700_v41 }
 0x485   : > { %v960_v8 = vpop.permute.xlu2 %959 }
 0x486   : > { %v2085_v13 = vmul.f32 %v960_v8, %v931_v35 }
 0x48d   : > { %v962_v31 = vpop.permute.xlu0 %961  ;;  %v1008_v11 = vpop.permute.xlu2 %1007 }
 0x48e   : > { %v2087_v15 = vmul.f32 %v962_v31, %v932_v44  ;;  %v2089_v16 = vmul.f32 %v1008_v11, %v978_v45 }
 0x490   : > { %v1059_v17 = vpack.c.bf16 %v2087_v15, %v2085_v13  ;;  %v1088_v18 = vpack.c.bf16 %v2089_v16, %v2083_v12 }
 0x492   : > { %1061 = vrot.lane.b32.xlu0 %v1059_v17, %s1801_s20  ;;  %1090 = vrot.lane.b32.xlu1 %v1088_v18, %s1801_s20 }
 0x504   : > { %v1062_v19 = vpop.permute.xlu0 %1061  ;;  %v1091_v20 = vpop.permute.xlu1 %1090 }
 0x505   : > { %1614 = vmatmul.msk.bf16.vlgmr.msra.gmra.mxu2 %vm431_vm1, %v1062_v19  ;;  %1615 = vmatmul.msk.bf16.vlgmr.msra.gmra.mxu3 %vm431_vm1, %v1091_v20 }
 0x588   : > { %v1075_v34 = vpop.f32.mrf.mxu2  ;;  %v1104_v35 = vpop.f32.mrf.mxu3 }
 0x589   : > { %v1080_v37 = vadd.f32 %v1075_v34, %v1057_v33  ;;  %v1109_v38 = vadd.f32 %v1104_v35, %v1086_v32 }
 0x58b   : > { %v1111_v43 = vmul.f32 0.5, %v1080_v37  ;;  %v1157_v44 = vmul.f32 0.5, %v1109_v38 }
 0x58d   : > { %v1113_v45 = vsel %vm1949_vm4, %v1080_v37, %v1111_v43  ;;  %v1159_v46 = vsel %vm1949_vm4, %v1109_v38, %v1157_v44 }
 0x58e   : > { %1760 = vtanh.f32 %v1113_v45  ;;  %v1624_v45 = vld [vmem:[%s1875_s19 + $0x18] sm:$0xff]  ;;  %s2180_s19 = sshll.u32 %s1867_s14, 2 }
 0x58f   : > { %1762 = vtanh.f32 %v1159_v46  ;;  %1564 = vmatmul.msk.bf16.gmra.mxu0 %vm431_vm1, %v1624_v45  ;;  %s857_s18 = sadd.s32 1, %s2180_s19  ;;  %s1047_s21 = sadd.s32 2, %s2180_s19 }
 0x590   : > { %v1077_v53 = vpop.f32.mrf.mxu2  ;;  %v1106_v54 = vpop.f32.mrf.mxu3  ;;  %s1237_s23 = sadd.s32 3, %s2180_s19 }
 0x591   : > { %v1081_v55 = vadd.f32 %v1077_v53, %v1058_v49  ;;  %v1110_v56 = vadd.f32 %v1106_v54, %v1087_v50 }
 0x593   : > { %v1112_v57 = vmul.f32 0.5, %v1081_v55  ;;  %v1158_v58 = vmul.f32 0.5, %v1110_v56 }
 0x594   : > { %v1761_v59 = vpop.eup %1760 }
 0x595   : > { %v1763_v61 = vpop.eup %1762  ;;  %v1114_v62 = vsel %vm1949_vm4, %v1081_v55, %v1112_v57  ;;  %v1160_v63 = vsel %vm1949_vm4, %v1110_v56, %v1158_v58  ;;  %v1117_v9 = vmul.f32 0.5, %v1761_v59 }
 0x596   : > { %1764 = vtanh.f32 %v1114_v62  ;;  %v1163_v36 = vmul.f32 0.5, %v1763_v61 }
 0x597   : > { %1766 = vtanh.f32 %v1160_v63  ;;  %v1119_v14 = vadd.f32 0.5, %v1117_v9 }
 0x598   : > { %v1165_v2 = vadd.f32 0.5, %v1163_v36 }
 0x599   : > { %v1121_v39 = vsel %vm1949_vm4, %v1761_v59, %v1119_v14  ;;  %v1630_v59 = vld [vmem:[%s1880_s22 + $0x18] sm:$0xff] }
 0x59a   : > { %v1167_v6 = vsel %vm1949_vm4, %v1763_v61, %v1165_v2  ;;  %1127 = vrot.lane.b32.xlu2 %v1121_v39, %s1802_s28  ;;  %v1123_v26 = vmul.f32 %v1121_v39, %v2069_v1  ;;  %1592 = vmatmul.msk.bf16.gmra.mxu1 %vm431_vm1, %v1630_v59 }
 0x59b   : > { %1173 = vrot.lane.b32.xlu1 %v1167_v6, %s1802_s28  ;;  %v1169_v30 = vmul.f32 %v1167_v6, %v2059_v60 }
 0x59c   : > { %v1765_v5 = vpop.eup %1764 }
 0x59d   : > { %v1767_v7 = vpop.eup %1766  ;;  %v1118_v24 = vmul.f32 0.5, %v1765_v5 }
 0x59e   : > { %v1164_v8 = vmul.f32 0.5, %v1767_v7 }
 0x59f   : > { %v1120_v10 = vadd.f32 0.5, %v1118_v24 }
 0x5a0   : > { %v1166_v31 = vadd.f32 0.5, %v1164_v8  ;;  %v1803_v8 = vmov 0  }
 0x5a1   : > { %v1122_v11 = vsel %vm1949_vm4, %v1765_v5, %v1120_v10  ;;  %1723 = vset.pattern.permute.xlu2 %v1803_v8  ;;  %1724 = vset.pattern.permute.xlu0 %v1803_v8 }
 0x5a2   : > { %1129 = vrot.lane.b32.xlu0 %v1122_v11, %s1802_s28  ;;  %v1168_v17 = vsel %vm1949_vm4, %v1767_v7, %v1166_v31  ;;  %v1124_v1 = vmul.f32 %v1122_v11, %v2064_v0  ;;  %1725 = vset.pattern.permute.xlu1 %v1803_v8 }
 0x5a3   : > { %1175 = vrot.lane.b32.xlu2 %v1168_v17, %s1802_s28  ;;  %v1170_v35 = vmul.f32 %v1168_v17, %v2073_v4 }
 0x5f4   : > { %v1128_v18 = vpop.permute.xlu2 %1127 }
 0x5f5   : > { %v1133_v19 = vmul.f32 %v1128_v18, %v1121_v39 }
 0x5f7   : > { %1137 = vrot.lane.b32.xlu0 %v1133_v19, %s1801_s20 }
 0x5fd   : > { %v1176_v20 = vpop.permute.xlu2 %1175 }
 0x5fe   : > { %v1180_v3 = vmul.f32 %v1176_v20, %v1168_v17 }
 0x600   : > { %1185 = vrot.lane.b32.xlu0 %v1180_v3, %s1801_s20 }
 0x60c   : > { %v468_v63 = vpop.f32.mrf.mxu0 }
 0x60d   : > { %v1174_v21 = vpop.permute.xlu1 %1173 }
 0x60e   : > { %v1179_v22 = vmul.f32 %v1174_v21, %v1167_v6 }
 0x610   : > { %1183 = vrot.lane.b32.xlu2 %v1179_v22, %s1801_s20 }
 0x614   : > { %v1130_v23 = vpop.permute.xlu0 %1129  ;;  %v470_v9 = vpop.f32.mrf.mxu0 }
 0x615   : > { %v1134_v25 = vmul.f32 %v1130_v23, %v1122_v11  ;;  %v1670_v36 = vpack.c.bf16 %v470_v9, %v468_v63  ;;  %v2214_v9 = vld [vmem:[%s2350_s0 + $0x8] sm:$0xff] }
 0x617   : > { %1139 = vrot.lane.b32.xlu1 %v1134_v25, %s1801_s20  ;;  %v1703_v14 = vunpack.c.l.bf16 %v1670_v36  ;;  %v553_v24 = vpop.f32.mrf.mxu1 }
 0x619   : > { %v1247_v2 = vadd.f32 %v1938_v27, %v1703_v14 }
 0x61f   : > { %v555_v3 = vpop.f32.mrf.mxu1 }
 0x620   : > { %v1675_v23 = vpack.c.bf16 %v555_v3, %v553_v24  ;;  %v858_v3 = vstv %s857_s18 }
 0x621   : > { %vm860_vm8 = vcmp.lt.s32.totalorder %v858_v3, %v2214_v9 }
 0x669   : > { %v1138_v28 = vpop.permute.xlu0 %1137 }
 0x66a   : > { %v2129_v32 = vadd.f32 %v1138_v28, %v1123_v26  ;;  %v1184_v33 = vpop.permute.xlu2 %1183  ;;  %v1707_v26 = vunpack.c.l.bf16 %v1675_v23 }
 0x66b   : > { %v2131_v34 = vadd.f32 %v1184_v33, %v1169_v30 }
 0x66c   : > { %1768 = vtanh.f32 %v2129_v32  ;;  %v1276_v33 = vadd.f32 %v1943_v29, %v1707_v26 }
 0x66d   : > { %1770 = vtanh.f32 %v2131_v34 }
 0x672   : > { %v1769_v37 = vpop.eup %1768  ;;  %v1186_v38 = vpop.permute.xlu0 %1185 }
 0x673   : > { %v1771_v40 = vpop.eup %1770  ;;  %v2136_v41 = vadd.f32 %v1186_v38, %v1170_v35  ;;  %1149 = vrot.lane.b32.xlu1 %v1769_v37, %s1802_s28  ;;  %v2190_v38 = vld [vmem:[%s2350_s0] sm:$0xff] }
 0x674   : > { %1195 = vrot.lane.b32.xlu0 %v1771_v40, %s1802_s28  ;;  %v620_v40 = vstv %s2180_s19  ;;  %vm859_vm7 = vcmp.lt.s32.totalorder %v858_v3, %v2190_v38 }
 0x675   : > { %1772 = vtanh.f32 %v2136_v41  ;;  %vm621_vm5 = vcmp.lt.s32.totalorder %v620_v40, %v2190_v38  ;;  %vm622_vm6 = vcmp.lt.s32.totalorder %v620_v40, %v2214_v9 }
 0x67b   : > { %v1773_v60 = vpop.eup %1772 }
 0x67c   : > { %1197 = vrot.lane.b32.xlu1 %v1773_v60, %s1802_s28 }
 0x689   : > { %v1140_v43 = vpop.permute.xlu1 %1139 }
 0x68a   : > { %v2143_v44 = vadd.f32 %v1140_v43, %v1124_v1  ;;  %v1708_v1 = vunpack.c.h.bf16 %v1675_v23 }
 0x68c   : > { %1774 = vtanh.f32 %v2143_v44 }
 0x692   : > { %v1775_v4 = vpop.eup %1774 }
 0x693   : > { %1151 = vrot.lane.b32.xlu2 %v1775_v4, %s1802_s28  ;;  %v2198_v4 = vld [vmem:[%s2351_s1] sm:$0xff] }
 0x6e5   : > { %v1150_v46 = vpop.permute.xlu1 %1149 }
 0x6e6   : > { %v1196_v49 = vpop.permute.xlu0 %1195  ;;  %v2149_v53 = vmul.f32 %v1150_v46, %v1121_v39  ;;  %v623_v46 = vsel %vm621_vm5, %v2198_v4, 0.0 }
 0x6e7   : > { %v2153_v55 = vmul.f32 %v1196_v49, %v1167_v6  ;;  %v1704_v6 = vunpack.c.h.bf16 %v1670_v36  ;;  %v1277_v49 = vadd.f32 %v1943_v29, %v1708_v1  ;;  %v2221_v36 = vld [vmem:[%s2351_s1 + $0x8] sm:$0xff] }
 0x6e9   : > { %v1248_v31 = vadd.f32 %v1938_v27, %v1704_v6 }
 0x6ed   : > { %v1152_v50 = vpop.permute.xlu2 %1151 }
 0x6ee   : > { %v2151_v54 = vmul.f32 %v1152_v50, %v1122_v11  ;;  %v1198_v0 = vpop.permute.xlu1 %1197 }
 0x6ef   : > { %v2155_v56 = vmul.f32 %v1198_v0, %v1168_v17 }
 0x6f0   : > { %v1249_v57 = vpack.c.bf16 %v2151_v54, %v2149_v53 }
 0x6f1   : > { %v1278_v58 = vpack.c.bf16 %v2155_v56, %v2153_v55 }
 0x6f2   : > { %1251 = vrot.lane.b32.xlu2 %v1249_v57, %s1801_s20 }
 0x6f3   : > { %1280 = vrot.lane.b32.xlu0 %v1278_v58, %s1801_s20 }
 0x74c   : > { %v1252_v61 = vpop.permute.xlu2 %1251 }
 0x74d   : > { %1616 = vmatmul.msk.bf16.vlgmr.msrb.gmra.mxu2 %vm431_vm1, %v1252_v61 }
 0x765   : > { %v1281_v62 = vpop.permute.xlu0 %1280 }
 0x766   : > { %1617 = vmatmul.msk.bf16.vlgmr.msrb.gmra.mxu3 %vm431_vm1, %v1281_v62 }
 0x7d0   : > { %v1265_v39 = vpop.f32.mrf.mxu2 }
 0x7d1   : > { %v1270_v5 = vadd.f32 %v1265_v39, %v1247_v2  ;;  %v624_v2 = vsel %vm622_vm6, %v2221_v36, 0.0 }
 0x7d3   : > { %v1301_v7 = vmul.f32 0.5, %v1270_v5 }
 0x7d5   : > { %v1303_v10 = vsel %vm1949_vm4, %v1270_v5, %v1301_v7 }
 0x7d6   : > { %1776 = vtanh.f32 %v1303_v10 }
 0x7d8   : > { %v1267_v11 = vpop.f32.mrf.mxu2 }
 0x7d9   : > { %v1271_v17 = vadd.f32 %v1267_v11, %v1248_v31 }
 0x7db   : > { %v1302_v18 = vmul.f32 0.5, %v1271_v17 }
 0x7dc   : > { %v1777_v19 = vpop.eup %1776 }
 0x7dd   : > { %v1304_v20 = vsel %vm1949_vm4, %v1271_v17, %v1302_v18  ;;  %v1307_v21 = vmul.f32 0.5, %v1777_v19 }
 0x7de   : > { %1778 = vtanh.f32 %v1304_v20 }
 0x7df   : > { %v1309_v22 = vadd.f32 0.5, %v1307_v21  ;;  %v861_v21 = vsel %vm859_vm7, %v2198_v4, 0.0 }
 0x7e1   : > { %v2175_v25 = vsel %vm1949_vm4, %v1777_v19, %v1309_v22 }
 0x7e2   : > { %1317 = vrot.lane.b32.xlu1 %v2175_v25, %s1802_s28 }
 0x7e4   : > { %v1779_v27 = vpop.eup %1778 }
 0x7e5   : > { %v1308_v28 = vmul.f32 0.5, %v1779_v27 }
 0x7e7   : > { %v1310_v30 = vadd.f32 0.5, %v1308_v28 }
 0x7e9   : > { %v1294_v35 = vpop.f32.mrf.mxu3  ;;  %v2185_v37 = vsel %vm1949_vm4, %v1779_v27, %v1310_v30 }
 0x7ea   : > { %v1299_v60 = vadd.f32 %v1294_v35, %v1276_v33  ;;  %1319 = vrot.lane.b32.xlu2 %v2185_v37, %s1802_s28  ;;  %v1048_v35 = vstv %s1047_s21 }
 0x7eb   : > { %vm1049_vm9 = vcmp.lt.s32.totalorder %v1048_v35, %v2190_v38  ;;  %vm1050_vm10 = vcmp.lt.s32.totalorder %v1048_v35, %v2214_v9 }
 0x7ec   : > { %v1347_v43 = vmul.f32 0.5, %v1299_v60  ;;  %v1051_v1 = vsel %vm1049_vm9, %v2198_v4, 0.0 }
 0x7ee   : > { %v1349_v45 = vsel %vm1949_vm4, %v1299_v60, %v1347_v43 }
 0x7ef   : > { %1780 = vtanh.f32 %v1349_v45 }
 0x7f1   : > { %v1296_v50 = vpop.f32.mrf.mxu3 }
 0x7f2   : > { %v1300_v0 = vadd.f32 %v1296_v50, %v1277_v49  ;;  %825 = vperm.xlu2 %1723, %v623_v46   ;;  %v1313_v49 = vmul.f32 %v2175_v25, %v2129_v32 }
 0x7f4   : > { %v1348_v57 = vmul.f32 0.5, %v1300_v0 }
 0x7f5   : > { %v1781_v58 = vpop.eup %1780 }
 0x7f6   : > { %v1350_v59 = vsel %vm1949_vm4, %v1300_v0, %v1348_v57  ;;  %v1353_v61 = vmul.f32 0.5, %v1781_v58  ;;  %v1052_v0 = vsel %vm1050_vm10, %v2221_v36, 0.0 }
 0x7f7   : > { %1782 = vtanh.f32 %v1350_v59 }
 0x7f8   : > { %v1355_v62 = vadd.f32 0.5, %v1353_v61  ;;  %v618_v61 = vld [vmem:[#allocation9] sm:$0xff] }
 0x7fa   : > { %v2209_v63 = vsel %vm1949_vm4, %v1781_v58, %v1355_v62 }
 0x7fb   : > { %1363 = vrot.lane.b32.xlu0 %v2209_v63, %s1802_s28  ;;  %v1359_v50 = vmul.f32 %v2209_v63, %v2131_v34 }
 0x7fd   : > { %v1783_v29 = vpop.eup %1782 }
 0x7fe   : > { %v1354_v14 = vmul.f32 0.5, %v1783_v29 }
 0x800   : > { %v1356_v39 = vadd.f32 0.5, %v1354_v14  ;;  %v613_v14 = vld [vmem:[#allocation6 + $0x8] sm:$0xff] }
 0x802   : > { %v2227_v6 = vsel %vm1949_vm4, %v1783_v29, %v1356_v39 }
 0x803   : > { %830 = vperm.xlu0 %1724, %v624_v2   ;;  %1365 = vrot.lane.b32.xlu1 %v2227_v6, %s1802_s28  ;;  %v1360_v32 = vmul.f32 %v2227_v6, %v2136_v41 }
 0x844   : > { %v1320_v5 = vpop.permute.xlu2 %1319 }
 0x845   : > { %v1324_v7 = vmul.f32 %v1320_v5, %v2185_v37 }
 0x847   : > { %1329 = vrot.lane.b32.xlu2 %v1324_v7, %s1801_s20 }
 0x84c   : > { %v826_v24 = vpop.permute.xlu2 %825 }
 0x84d   : > { %v833_v8 = vmul.f32 %v826_v24, %v2010_v51  ;;  %v845_v22 = vmul.f32 %v826_v24, %v2002_v47  ;;  %v1314_v47 = vmul.f32 %v2185_v37, %v2143_v44  ;;  %v1238_v44 = vstv %s1237_s23 }
 0x84e   : > { %vm1239_vm11 = vcmp.lt.s32.totalorder %v1238_v44, %v2190_v38  ;;  %vm1240_vm12 = vcmp.lt.s32.totalorder %v1238_v44, %v2214_v9  ;;  %v619_v44 = vld [vmem:[#allocation9 + $0x8] sm:$0xff] }
 0x84f   : > { %837 = vrot.lane.b32.xlu0 %v833_v8, %s1801_s20  ;;  %v1241_v58 = vsel %vm1239_vm11, %v2198_v4, 0.0 }
 0x854   : > { %v1318_v10 = vpop.permute.xlu1 %1317 }
 0x855   : > { %v1323_v42 = vmul.f32 %v1318_v10, %v2175_v25 }
 0x857   : > { %1327 = vrot.lane.b32.xlu1 %v1323_v42, %s1801_s20 }
 0x86d   : > { %v1364_v31 = vpop.permute.xlu0 %1363 }
 0x86e   : > { %v1369_v11 = vmul.f32 %v1364_v31, %v2209_v63  ;;  %v612_v31 = vld [vmem:[#allocation6] sm:$0xff] }
 0x870   : > { %1373 = vrot.lane.b32.xlu1 %v1369_v11, %s1801_s20 }
 0x875   : > { %v831_v17 = vpop.permute.xlu0 %830  ;;  %v1366_v18 = vpop.permute.xlu1 %1365 }
 0x876   : > { %v834_v19 = vmul.f32 %v831_v17, %v2012_v52  ;;  %v846_v20 = vmul.f32 %v831_v17, %v2004_v48  ;;  %v1370_v51 = vmul.f32 %v1366_v18, %v2227_v6  ;;  %v862_v48 = vsel %vm860_vm8, %v2221_v36, 0.0 }
 0x878   : > { %851 = vrot.lane.b32.xlu0 %v846_v20, %s1801_s20  ;;  %839 = vrot.lane.b32.xlu1 %v834_v19, %s1801_s20 }
 0x879   : > { %1375 = vrot.lane.b32.xlu2 %v1370_v51, %s1801_s20 }
 0x880   : > { %1015 = vperm.xlu1 %1725, %v861_v21  }
 0x881   : > { %849 = vrot.lane.b32.xlu2 %v845_v22, %s1801_s20 }
 0x889   : > { %1020 = vperm.xlu2 %1723, %v862_v48  }
 0x8a1   : > { %v1330_v52 = vpop.permute.xlu2 %1329 }
 0x8a2   : > { %v2258_v60 = vadd.f32 %v1330_v52, %v1314_v47 }
 0x8a4   : > { %1784 = vtanh.f32 %v2258_v60 }
 0x8aa   : > { %v1785_v46 = vpop.eup %1784 }
 0x8c1   : > { %v838_v2 = vpop.permute.xlu0 %837 }
 0x8c9   : > { %v1328_v27 = vpop.permute.xlu1 %1327 }
 0x8d3   : > { %v1376_v23 = vpop.permute.xlu2 %1375 }
 0x8d4   : > { %v1380_v34 = vadd.f32 %v1376_v23, %v1360_v32 }
 0x8db   : > { %v850_v26 = vpop.permute.xlu2 %849 }
 0x8dc   : > { %v855_v62 = vadd.f32 %v850_v26, %v618_v61 }
 0x8e2   : > { %v1374_v28 = vpop.permute.xlu1 %1373 }
 0x8e3   : > { %v1021_v30 = vpop.permute.xlu2 %1020 }
 0x8e4   : > { %v1024_v33 = vmul.f32 %v1021_v30, %v2087_v15  ;;  %v1036_v57 = vmul.f32 %v1021_v30, %v2089_v16  ;;  %v1242_v16 = vsel %vm1240_vm12, %v2221_v36, 0.0 }
 0x8e6   : > { %1029 = vrot.lane.b32.xlu1 %v1024_v33, %s1801_s20 }
 0x8ea   : > { %v840_v40 = vpop.permute.xlu1 %839  ;;  %v2292_v9 = vpop.permute.xlu0 %851 }
 0x8eb   : > { %v844_v39 = vadd.f32 %v840_v40, %v613_v14 }
 0x8ee   : > { %1205 = vperm.xlu1 %1725, %v1051_v1  }
 0x8f2   : > { %v1016_v43 = vpop.permute.xlu1 %1015 }
 0x8f3   : > { %v1023_v15 = vmul.f32 %v1016_v43, %v2085_v13  ;;  %v1035_v45 = vmul.f32 %v1016_v43, %v2083_v12  ;;  %v1333_v13 = vadd.f32 %v1328_v27, %v1313_v49  ;;  %v2274_v12 = vadd.f32 %v1374_v28, %v1359_v50 }
 0x8f5   : > { %1039 = vrot.lane.b32.xlu2 %v1035_v45, %s1801_s20  ;;  %1027 = vrot.lane.b32.xlu0 %v1023_v15, %s1801_s20  ;;  %1786 = vtanh.f32 %v1333_v13 }
 0x8f6   : > { %1341 = vrot.lane.b32.xlu1 %v1785_v46, %s1802_s28  ;;  %1788 = vtanh.f32 %v2274_v12 }
 0x8f7   : > { %1790 = vtanh.f32 %v1380_v34 }
 0x8fb   : > { %v1787_v38 = vpop.eup %1786 }
 0x8fc   : > { %v1789_v59 = vpop.eup %1788 }
 0x8fd   : > { %1210 = vperm.xlu2 %1723, %v1052_v0   ;;  %1041 = vrot.lane.b32.xlu0 %v1036_v57, %s1801_s20  ;;  %v1791_v4 = vpop.eup %1790 }
 0x8fe   : > { %1395 = vperm.xlu1 %1725, %v1241_v58  }
 0x905   : > { %1385 = vrot.lane.b32.xlu2 %v1789_v59, %s1802_s28  ;;  %1339 = vrot.lane.b32.xlu0 %v1787_v38, %s1802_s28 }
 0x90d   : > { %1400 = vperm.xlu2 %1723, %v1242_v16   ;;  %1387 = vrot.lane.b32.xlu0 %v1791_v4, %s1802_s28 }
 0x94f   : > { %v1040_v29 = vpop.permute.xlu2 %1039 }
 0x950   : > { %v2288_v41 = vadd.f32 %v1040_v29, %v855_v62 }
 0x957   : > { %v1211_v5 = vpop.permute.xlu2 %1210 }
 0x958   : > { %v1214_v7 = vmul.f32 %v1211_v5, %v2151_v54  ;;  %v1030_v24 = vpop.permute.xlu1 %1029  ;;  %v843_v54 = vadd.f32 %v838_v2, %v612_v31  ;;  %v1226_v18 = vmul.f32 %v1211_v5, %v2155_v56 }
 0x959   : > { %v1034_v8 = vadd.f32 %v1030_v24, %v844_v39 }
 0x95a   : > { %1219 = vrot.lane.b32.xlu1 %v1214_v7, %s1801_s20 }
 0x960   : > { %v1206_v36 = vpop.permute.xlu1 %1205 }
 0x961   : > { %v1213_v10 = vmul.f32 %v1206_v36, %v2149_v53  ;;  %v1225_v42 = vmul.f32 %v1206_v36, %v2153_v55  ;;  %v1386_v55 = vpop.permute.xlu2 %1385 }
 0x962   : > { %1439 = vrot.lane.b32.xlu1 %v1333_v13, %s1804_s24  ;;  %v1391_v20 = vmul.f32 %v1386_v55, %v2209_v63 }
 0x963   : > { %1229 = vrot.lane.b32.xlu2 %v1225_v42, %s1801_s20  ;;  %1217 = vrot.lane.b32.xlu0 %v1213_v10, %s1801_s20 }
 0x967   : > { %v1028_v11 = vpop.permute.xlu0 %1027 }
 0x968   : > { %v1033_v17 = vadd.f32 %v1028_v11, %v843_v54  ;;  %v1342_v53 = vpop.permute.xlu1 %1341 }
 0x969   : > { %v1346_v56 = vmul.f32 %v1342_v53, %v2185_v37  ;;  %v1401_v52 = vpop.permute.xlu2 %1400 }
 0x96b   : > { %1441 = vrot.lane.b32.xlu2 %v2258_v60, %s1804_s24  ;;  %1231 = vrot.lane.b32.xlu0 %v1226_v18, %s1801_s20  ;;  %v1404_v27 = vmul.f32 %v1401_v52, %v1346_v56 }
 0x96f   : > { %v1042_v19 = vpop.permute.xlu0 %1041 }
 0x970   : > { %v1396_v51 = vpop.permute.xlu1 %1395 }
 0x971   : > { %v1415_v22 = vmul.f32 %v1396_v51, %v1391_v20 }
 0x973   : > { %1451 = vrot.lane.b32.xlu0 %v1391_v20, %s1801_s20 }
 0x977   : > { %v1340_v3 = vpop.permute.xlu0 %1339 }
 0x978   : > { %v1345_v21 = vmul.f32 %v1340_v3, %v2175_v25 }
 0x97a   : > { %v1403_v48 = vmul.f32 %v1396_v51, %v1345_v21  ;;  %1429 = vrot.lane.b32.xlu2 %v1345_v21, %s1801_s20 }
 0x97b   : > { %1419 = vrot.lane.b32.xlu0 %v1415_v22, %s1801_s20 }
 0x97c   : > { %1407 = vrot.lane.b32.xlu1 %v1403_v48, %s1801_s20 }
 0x97f   : > { %v1388_v23 = vpop.permute.xlu0 %1387 }
 0x980   : > { %v1392_v63 = vmul.f32 %v1388_v23, %v2227_v6 }
 0x982   : > { %v1416_v26 = vmul.f32 %v1401_v52, %v1392_v63  ;;  %1409 = vrot.lane.b32.xlu2 %v1404_v27, %s1801_s20 }
 0x983   : > { %1431 = vrot.lane.b32.xlu0 %v1346_v56, %s1801_s20 }
 0x984   : > { %1421 = vrot.lane.b32.xlu1 %v1416_v26, %s1801_s20 }
 0x98a   : > { %1461 = vrot.lane.b32.xlu2 %v2274_v12, %s1804_s24  ;;  %v856_v12 = vadd.f32 %v2292_v9, %v619_v44 }
 0x98b   : > { %1463 = vrot.lane.b32.xlu0 %v1380_v34, %s1804_s24 }
 0x98c   : > { %1453 = vrot.lane.b32.xlu1 %v1392_v63, %s1801_s20  ;;  %v1046_v0 = vadd.f32 %v1042_v19, %v856_v12 }
 0x9bd   : > { %v1230_v25 = vpop.permute.xlu2 %1229 }
 0x9be   : > { %v1235_v15 = vadd.f32 %v1230_v25, %v2288_v41 }
 0x9c5   : > { %v1442_v37 = vpop.permute.xlu2 %1441 }
 0x9c6   : > { %1446 = vst.msk [vmem:[#allocation5 + $0x8] sm:$0xff] %vm431_vm1, %v1442_v37 }
 0x9cc   : > { %v1220_v28 = vpop.permute.xlu1 %1219 }
 0x9cd   : > { %v1224_v35 = vadd.f32 %v1220_v28, %v1034_v8 }
 0x9d4   : > { %v1440_v6 = vpop.permute.xlu1 %1439  ;;  %v1430_v30 = vpop.permute.xlu2 %1429 }
 0x9d5   : > { %1445 = vst.msk [vmem:[#allocation5] sm:$0xff] %vm431_vm1, %v1440_v6  ;;  %v1218_v33 = vpop.permute.xlu0 %1217 }
 0x9d6   : > { %1435 = vst.msk [vmem:[#allocation4] sm:$0xff] %vm431_vm1, %v1430_v30  ;;  %v1223_v45 = vadd.f32 %v1218_v33, %v1033_v17 }
 0x9dc   : > { %v1410_v47 = vpop.permute.xlu2 %1409 }
 0x9dd   : > { %v1414_v40 = vadd.f32 %v1410_v47, %v1224_v35  ;;  %v1232_v60 = vpop.permute.xlu0 %1231 }
 0x9de   : > { %v1236_v57 = vadd.f32 %v1232_v60, %v1046_v0 }
 0x9df   : > { %1448 = vst.msk [vmem:[#allocation6 + $0x8] sm:$0xff] %vm431_vm1, %v1414_v40 }
 0x9e4   : > { %v1462_v1 = vpop.permute.xlu2 %1461 }
 0x9e5   : > { %1467 = vst.msk [vmem:[#allocation8] sm:$0xff] %vm431_vm1, %v1462_v1  ;;  %v1452_v43 = vpop.permute.xlu0 %1451 }
 0x9e6   : > { %1457 = vst.msk [vmem:[#allocation7] sm:$0xff] %vm431_vm1, %v1452_v43 }
 0x9ed   : > { %v1420_v46 = vpop.permute.xlu0 %1419 }
 0x9ee   : > { %v1425_v49 = vadd.f32 %v1420_v46, %v1235_v15  ;;  %v1408_v50 = vpop.permute.xlu1 %1407 }
 0x9ef   : > { %v1413_v13 = vadd.f32 %v1408_v50, %v1223_v45 }
 0x9f0   : > { %1469 = vst.msk [vmem:[#allocation9] sm:$0xff] %vm431_vm1, %v1425_v49 }
 0x9f1   : > { %1447 = vst.msk [vmem:[#allocation6] sm:$0xff] %vm431_vm1, %v1413_v13 }
 0x9f5   : > { %v1432_v58 = vpop.permute.xlu0 %1431 }
 0x9f6   : > { %1436 = vst.msk [vmem:[#allocation4 + $0x8] sm:$0xff] %vm431_vm1, %v1432_v58  ;;  %v1422_v32 = vpop.permute.xlu1 %1421 }
 0x9f7   : > { %v1426_v34 = vadd.f32 %v1422_v32, %v1236_v57 }
 0x9f9   : > { %1470 = vst.msk [vmem:[#allocation9 + $0x8] sm:$0xff] %vm431_vm1, %v1426_v34 }
 0x9fb   : > { %1474 = sbr.rel (%p1618_p5) target bundleno = 2684 (0xa7c), region = 68 }
 0x9fd   : > { %v1464_v38 = vpop.permute.xlu0 %1463 }
 0x9fe   : > { %1468 = vst.msk [vmem:[#allocation8 + $0x8] sm:$0xff] %vm431_vm1, %v1464_v38  ;;  %v1454_v59 = vpop.permute.xlu1 %1453 }
 0x9ff   : > { %1458 = vst.msk [vmem:[#allocation7 + $0x8] sm:$0xff] %vm431_vm1, %v1454_v59 }
 0xa00   : > { %1475 = vst.msk [vmem:[%s2360_s10] sm:$0xff] %vm431_vm1, %v1413_v13  ;;  %1479 = vrot.lane.b32.xlu0 %v1425_v49, %s1805_s26  ;;  %vm1485_vm13 = vcmask 523520  }
 0xa01   : > { %1476 = vst.msk [vmem:[%s2360_s10 + $0x8] sm:$0xff] %vm431_vm1, %v1414_v40 }
 0xa08   : > { %1481 = vrot.lane.b32.xlu0 %v1426_v34, %s1805_s26 }
 0xa72   : > { %v1480_v16 = vpop.permute.xlu0 %1479 }
 0xa73   : > { %1486 = vst.msk [vmem:[%s2360_s10] sm:$0xff] %vm1485_vm13, %v1480_v16 }
 0xa7a   : > { %v1482_v4 = vpop.permute.xlu0 %1481 }
 0xa7b   : > { %1487 = vst.msk [vmem:[%s2360_s10 + $0x8] sm:$0xff] %vm1485_vm13, %v1482_v4 }
 0xa7c PF: > { %s20_s13 = sadd.s32 1, %s1798_s13  }
 0xa7d   : > { %p17_p6 = scmp.ge.s32.totalorder %s20_s13, 4  }
 0xa7f   :  { %19 = sbr.rel (!%p17_p6) target bundleno = 1 (0x1), region = 103 }

</bundles_post_ra>
